<compile_context>
chip_gen: v7x
topology: tpu7x:2x2x1
jax: 0.10.0
libtpu: 0.0.40
codegen_flags: <defaults>
</compile_context>

<pallas_src>
import jax
import jax.numpy as jnp
from jax.experimental import pallas as pl
from jax.experimental.pallas import tpu as pltpu

HIDDEN = 128
CHUNK = 512          # 16 kHz chunk length expected by the reference model
STFT_CH = 129        # STFT channels kept by the reference ([:129])
STFT_CH_PAD = 256    # zero-padded to a full lane tile
N_FRAMES = 4         # (512 + 2*64 - 256) // 128 + 1
OUT_W = 128          # lane-dense width of the probability output


def silero_vad_kernel(
    x_ref, basis_ref,
    w1a_ref, w1b_ref, b1_ref,
    w2_ref, b2_ref, w3_ref, b3_ref, w4_ref, b4_ref,
    wlstm_ref, blstm_ref, whead_ref, bhead_ref,
    h0_ref, c0_ref,
    out_ref, h_out_ref, c_out_ref,
    h_s, c_s):
  """One 512-sample chunk per grid step; h/c carried in VMEM scratch."""
  f32 = jnp.float32
  H = HIDDEN

  t = pl.program_id(0)

  @pl.when(t == 0)
  def _init_state():
    h_s[...] = h0_ref[...]
    c_s[...] = c0_ref[...]

  def mm(a, w_ref):
    # Weights are stored bf16; accumulate in f32 on the MXU.
    return jnp.dot(a.astype(jnp.bfloat16), w_ref[...],
                   preferred_element_type=f32)

  # ---- ConvSTFT + first EncoderBlock ReLU.
  # Reflect-pad, framing, [:129] slice and channel zero-pad are folded into
  # basis_ref (512, 4*256), so the STFT of the raw chunk is a single matmul
  # and s = [S0|S1|S2|S3] is already lane-concatenated at 256-lane boundaries.
  s = jnp.maximum(mm(x_ref[...], basis_ref), 0.0)            # (B, 1024)

  # ---- EncoderBlock 1: ReLU -> Conv1d(129->128, k=3, pad=1, stride=2), L 4->2
  # Tap-wise matmuls are K-fused: y0 uses taps [1,2] on [S0|S1]; y1 uses taps
  # [0,1,2] on [S1|S2|S3]; both operands are contiguous lane slices of `s`.
  b1 = b1_ref[...]
  y0 = mm(s[:, 0:2 * STFT_CH_PAD], w1a_ref) + b1             # (B, 128)
  y1 = mm(s[:, STFT_CH_PAD:4 * STFT_CH_PAD], w1b_ref) + b1   # (B, 128)

  # ---- EncoderBlock 2: ReLU -> Conv1d(128->64, k=3, pad=1, stride=2), L 2->1
  ry = jnp.concatenate([jnp.maximum(y0, 0.0), jnp.maximum(y1, 0.0)], axis=1)
  z0 = mm(ry, w2_ref) + b2_ref[...]                          # (B, 128), lanes>=64 are 0

  # ---- EncoderBlock 3: ReLU -> Conv1d(64->64, k=3, pad=1, stride=1), L 1->1
  u0 = mm(jnp.maximum(z0, 0.0), w3_ref) + b3_ref[...]        # (B, 128), lanes>=64 are 0

  # ---- EncoderBlock 4: ReLU -> Conv1d(64->128, k=3, pad=1, stride=1), L 1->1
  feat = mm(jnp.maximum(u0, 0.0), w4_ref) + b4_ref[...]      # == encoder_out[:, :, -1]

  # ---- LSTMCell(128, 128): fused [x|h] @ [Wih; Whh]; gate order (i, f, g, o).
  h_prev = h_s[...]
  c_prev = c_s[...]
  gates = (mm(jnp.concatenate([feat, h_prev], axis=1), wlstm_ref)
           + blstm_ref[...])                                 # (B, 512)
  i_g = jax.nn.sigmoid(gates[:, 0 * H:1 * H])
  f_g = jax.nn.sigmoid(gates[:, 1 * H:2 * H])
  g_g = jnp.tanh(gates[:, 2 * H:3 * H])
  o_g = jax.nn.sigmoid(gates[:, 3 * H:4 * H])
  c_new = f_g * c_prev + i_g * g_g
  h_new = o_g * jnp.tanh(c_new)

  # ---- Decoder head: Dropout(0.1) -> ReLU -> Conv1d(128->1, k=1) -> Sigmoid.
  # TODO(synk): Dropout(0.1) treated as identity (inference semantics).
  # The 1x1 conv weight is lane-tiled to 128 identical columns so this store
  # is a full, unmasked lane tile; the wrapper reads lane 0.
  prob = jax.nn.sigmoid(mm(jnp.maximum(h_new, 0.0), whead_ref) + bhead_ref[...])

  h_s[...] = h_new
  c_s[...] = c_new
  out_ref[...] = prob
  h_out_ref[...] = h_new
  c_out_ref[...] = c_new


def init_params(key):
  """Synthetic parameters in the original PyTorch layouts."""
  ks = jax.random.split(key, 16)

  def w(k, shape, scale=0.05):
    return (scale * jax.random.normal(k, shape)).astype(jnp.float32)

  return {
      # ConvSTFT.forward_basis_buffer (registered buffer) -- synthetic init.
      "stft_basis": w(ks[0], (258, 1, 256)),
      # Encoder reparam convs (Cout, Cin, k=3).
      "enc1_w": w(ks[1], (128, 129, 3)), "enc1_b": w(ks[2], (128,)),
      "enc2_w": w(ks[3], (64, 128, 3)),  "enc2_b": w(ks[4], (64,)),
      "enc3_w": w(ks[5], (64, 64, 3)),   "enc3_b": w(ks[6], (64,)),
      "enc4_w": w(ks[7], (128, 64, 3)),  "enc4_b": w(ks[8], (128,)),
      # LSTMCell(128, 128).
      "lstm_wih": w(ks[9], (4 * HIDDEN, HIDDEN)),
      "lstm_whh": w(ks[10], (4 * HIDDEN, HIDDEN)),
      "lstm_bih": w(ks[11], (4 * HIDDEN,)),
      "lstm_bhh": w(ks[12], (4 * HIDDEN,)),
      # Decoder head Conv1d(128 -> 1, k=1).
      "head_w": w(ks[13], (1, HIDDEN, 1)),
      "head_b": w(ks[14], (1,)),
  }


def prepare_params(params):
  """One-time conversion of PyTorch-layout params into kernel-ready tensors.

  Call this once per model; the result is reused for every forward call so no
  transposes/pads/concats run in the per-call path.
  """
  f32, bf16 = jnp.float32, jnp.bfloat16

  def conv_taps(w):  # (Cout, Cin, k) -> list of per-tap (Cin, Cout) matrices
    return [w[:, :, j].T.astype(f32) for j in range(w.shape[2])]

  def pad_to(a, rows, cols):
    return jnp.pad(a, ((0, rows - a.shape[0]), (0, cols - a.shape[1])))

  def pad_bias(b, n):
    return jnp.pad(b.astype(f32), (0, n - b.shape[0])).reshape(1, n)

  # --- ConvSTFT folded basis: ReflectionPad1d(64) + 4 frames (win 256,
  # hop 128) + channel slice [:129] + zero-pad channels to 256, all folded
  # into one (512, 4*256) matrix applied to the raw 512-sample chunk.
  basis = params["stft_basis"][:STFT_CH, 0, :].astype(f32)      # (129, 256)
  basis_t = pad_to(basis.T, 256, STFT_CH_PAD)                   # (256, 256)
  refl_idx = jnp.concatenate([
      jnp.arange(64, 0, -1),          # left reflection: x[64] .. x[1]
      jnp.arange(CHUNK),              # body
      jnp.arange(510, 446, -1),       # right reflection: x[510] .. x[447]
  ])
  P = jax.nn.one_hot(refl_idx, CHUNK, dtype=f32)                # (640, 512)
  big_basis = jnp.concatenate(
      [P[128 * s:128 * s + 256].T @ basis_t for s in range(N_FRAMES)],
      axis=1)                                                   # (512, 1024)

  # --- Encoder conv taps -> channel-last matmul weights, K-concatenated per
  # output position and zero-padded so every matmul uses full lane tiles.
  t1 = [pad_to(w, STFT_CH_PAD, 128) for w in conv_taps(params["enc1_w"])]
  w1_y0 = jnp.concatenate([t1[1], t1[2]], axis=0)               # (512, 128)
  w1_y1 = jnp.concatenate([t1[0], t1[1], t1[2]], axis=0)        # (768, 128)

  t2 = conv_taps(params["enc2_w"])                              # 3 x (128, 64)
  w2 = pad_to(jnp.concatenate([t2[1], t2[2]], axis=0), 256, 128)  # (256, 128)
  w3 = pad_to(conv_taps(params["enc3_w"])[1], 128, 128)         # (128, 128)
  w4 = pad_to(conv_taps(params["enc4_w"])[1], 128, 128)         # (128, 128)

  # --- LSTM: fuse input/hidden matmuls into one (256, 512) weight.
  w_lstm = jnp.concatenate(
      [params["lstm_wih"].T, params["lstm_whh"].T], axis=0)     # (256, 512)
  b_lstm = (params["lstm_bih"] + params["lstm_bhh"]).astype(f32).reshape(1, -1)

  # --- Head: tile the (128, 1) weight to 128 identical columns so the
  # kernel's probability store is lane-dense.
  w_head = jnp.tile(params["head_w"].reshape(1, HIDDEN).T, (1, OUT_W))
  b_head = jnp.tile(params["head_b"].reshape(1, 1).astype(f32), (1, OUT_W))

  return {
      "big_basis": big_basis.astype(bf16),
      "w1_y0": w1_y0.astype(bf16), "w1_y1": w1_y1.astype(bf16),
      "b1": pad_bias(params["enc1_b"], 128),
      "w2": w2.astype(bf16), "b2": pad_bias(params["enc2_b"], 128),
      "w3": w3.astype(bf16), "b3": pad_bias(params["enc3_b"], 128),
      "w4": w4.astype(bf16), "b4": pad_bias(params["enc4_b"], 128),
      "w_lstm": w_lstm.astype(bf16), "b_lstm": b_lstm,
      "w_head": w_head.astype(bf16), "b_head": b_head,
  }


def _silero_vad_pallas(x, prep, h, c):
  """x: (T, B, 512) f32 -> (probs (T, B, 1), h_new, c_new)."""
  T, B, _ = x.shape
  H = HIDDEN

  def const2(shape):
    return pl.BlockSpec(shape, lambda t: (0, 0))   # VMEM-resident across T

  in_specs = [
      pl.BlockSpec((None, B, CHUNK), lambda t: (t, 0, 0)),        # x chunk t
      const2(prep["big_basis"].shape),
      const2(prep["w1_y0"].shape), const2(prep["w1_y1"].shape),
      const2(prep["b1"].shape),
      const2(prep["w2"].shape), const2(prep["b2"].shape),
      const2(prep["w3"].shape), const2(prep["b3"].shape),
      const2(prep["w4"].shape), const2(prep["b4"].shape),
      const2(prep["w_lstm"].shape), const2(prep["b_lstm"].shape),
      const2(prep["w_head"].shape), const2(prep["b_head"].shape),
      const2((B, H)), const2((B, H)),                             # h0, c0
  ]
  out_specs = (
      pl.BlockSpec((None, B, OUT_W), lambda t: (t, 0, 0)),        # prob (lane-tiled)
      pl.BlockSpec((B, H), lambda t: (0, 0)),                     # h (resident)
      pl.BlockSpec((B, H), lambda t: (0, 0)),                     # c (resident)
  )
  out_shape = (
      jax.ShapeDtypeStruct((T, B, OUT_W), jnp.float32),
      jax.ShapeDtypeStruct((B, H), jnp.float32),
      jax.ShapeDtypeStruct((B, H), jnp.float32),
  )

  probs, h_new, c_new = pl.pallas_call(
      silero_vad_kernel,
      grid=(T,),
      in_specs=in_specs,
      out_specs=out_specs,
      out_shape=out_shape,
      scratch_shapes=[pltpu.VMEM((B, H), jnp.float32),
                      pltpu.VMEM((B, H), jnp.float32)],
      # Recurrent state aliased in-place: h0 -> h_out, c0 -> c_out (P8).
      input_output_aliases={15: 1, 16: 2},
      compiler_params=pltpu.CompilerParams(
          dimension_semantics=("arbitrary",)),   # serial recurrence over T
  )(x, prep["big_basis"],
    prep["w1_y0"], prep["w1_y1"], prep["b1"],
    prep["w2"], prep["b2"], prep["w3"], prep["b3"], prep["w4"], prep["b4"],
    prep["w_lstm"], prep["b_lstm"], prep["w_head"], prep["b_head"],
    h, c)

  return probs[:, :, :1], h_new, c_new


_silero_vad_pallas_jit = jax.jit(_silero_vad_pallas)


def silero_vad_stream(x, prep, h=None, c=None):
  """Streaming forward: x (T, B, 512) processed in one pallas_call."""
  T, B, n = x.shape
  if n != CHUNK:
    raise ValueError(f"Expected 512-sample chunks, got {n}")
  if h is None:
    h = jnp.zeros((B, HIDDEN), jnp.float32)
  if c is None:
    c = jnp.zeros((B, HIDDEN), jnp.float32)
  probs, h_new, c_new = _silero_vad_pallas_jit(x.astype(jnp.float32), prep, h, c)
  return probs, (h_new, c_new)


def silero_vad_forward(x, prep, h=None, c=None, sr=16000):
  """Module-equivalent single-chunk forward: x (B, 512) -> ((B, 1), (h, c))."""
  # TODO(synk): the 8 kHz / 256-sample geometry of the reference module is not
  # folded into the basis; only the 16 kHz / 512-sample path is implemented.
  if sr != 16000:
    raise NotImplementedError("Only sr=16000 (512-sample chunks) is supported")
  if x.shape[-1] != CHUNK:
    raise ValueError(
        f"For 16kHz, input should have 512 samples but got {x.shape[-1]}")
  probs, (h_new, c_new) = silero_vad_stream(x[None], prep, h, c)
  return probs[0], (h_new, c_new)


if __name__ == "__main__":
  key = jax.random.PRNGKey(0)
  pkey, xkey, skey = jax.random.split(key, 3)
  params = init_params(pkey)
  prep = prepare_params(params)   # one-time weight prep, out of the call path

  B = 2
  x = jax.random.normal(xkey, (B, CHUNK), dtype=jnp.float32)

  out, (h1, c1) = silero_vad_forward(x, prep)
  out, h1, c1 = jax.block_until_ready((out, h1, c1))

  assert out.shape == (B, 1)
  assert h1.shape == (B, HIDDEN) and c1.shape == (B, HIDDEN)
  assert bool(jnp.all(jnp.isfinite(out)))
  assert bool(jnp.all((out > 0.0) & (out < 1.0)))   # sigmoid output range

  # Streaming path: T chunks in one pallas_call (weights VMEM-resident, h/c
  # carried in scratch) must match T chained single-chunk calls.
  T = 3
  xs = jax.random.normal(skey, (T, B, CHUNK), dtype=jnp.float32)
  probs, (hT, cT) = silero_vad_stream(xs, prep)
  probs, hT, cT = jax.block_until_ready((probs, hT, cT))
  assert probs.shape == (T, B, 1)

  h_ref, c_ref = None, None
  step_outs = []
  for step in range(T):
    o, (h_ref, c_ref) = silero_vad_forward(xs[step], prep, h_ref, c_ref)
    step_outs.append(o)
  ref = jnp.stack(step_outs, axis=0)
  assert bool(jnp.allclose(probs, ref, atol=1e-5, rtol=1e-5))
  assert bool(jnp.allclose(hT, h_ref, atol=1e-5, rtol=1e-5))
  assert bool(jnp.allclose(cT, c_ref, atol=1e-5, rtol=1e-5))

  print("KERNEL_OK")
</pallas_src>

<mosaic_0001>
module attributes {stable_mosaic.version = 11 : i64} {
  func.func @silero_vad_kernel(%arg0: i32, %arg1: memref<1x2x512xf32, #tpu.memory_space<vmem>>, %arg2: memref<512x1024xbf16, #tpu.memory_space<vmem>>, %arg3: memref<512x128xbf16, #tpu.memory_space<vmem>>, %arg4: memref<768x128xbf16, #tpu.memory_space<vmem>>, %arg5: memref<1x128xf32, #tpu.memory_space<vmem>>, %arg6: memref<256x128xbf16, #tpu.memory_space<vmem>>, %arg7: memref<1x128xf32, #tpu.memory_space<vmem>>, %arg8: memref<128x128xbf16, #tpu.memory_space<vmem>>, %arg9: memref<1x128xf32, #tpu.memory_space<vmem>>, %arg10: memref<128x128xbf16, #tpu.memory_space<vmem>>, %arg11: memref<1x128xf32, #tpu.memory_space<vmem>>, %arg12: memref<256x512xbf16, #tpu.memory_space<vmem>>, %arg13: memref<1x512xf32, #tpu.memory_space<vmem>>, %arg14: memref<128x128xbf16, #tpu.memory_space<vmem>>, %arg15: memref<1x128xf32, #tpu.memory_space<vmem>>, %arg16: memref<2x128xf32, #tpu.memory_space<vmem>>, %arg17: memref<2x128xf32, #tpu.memory_space<vmem>>, %arg18: memref<1x2x128xf32, #tpu.memory_space<vmem>>, %arg19: memref<2x128xf32, #tpu.memory_space<vmem>>, %arg20: memref<2x128xf32, #tpu.memory_space<vmem>>, %arg21: memref<2x128xf32, #tpu.memory_space<vmem>>, %arg22: memref<2x128xf32, #tpu.memory_space<vmem>>) attributes {dimension_semantics = [#tpu.dimension_semantics<arbitrary>], iteration_bounds = array<i64: 1>, scalar_prefetch = 0 : i64, scratch_operands = 2 : i64, tpu.core_type = #tpu.core_type<tc>, window_params = [{transform_indices = @transform_0, window_bounds = array<i64: 1, 2, 512>}, {pipeline_mode = #tpu.pipeline_mode<synchronous>, transform_indices = @transform_1, window_bounds = array<i64: 512, 1024>}, {pipeline_mode = #tpu.pipeline_mode<synchronous>, transform_indices = @transform_2, window_bounds = array<i64: 512, 128>}, {pipeline_mode = #tpu.pipeline_mode<synchronous>, transform_indices = @transform_3, window_bounds = array<i64: 768, 128>}, {pipeline_mode = #tpu.pipeline_mode<synchronous>, transform_indices = @transform_4, window_bounds = array<i64: 1, 128>}, {pipeline_mode = #tpu.pipeline_mode<synchronous>, transform_indices = @transform_5, window_bounds = array<i64: 256, 128>}, {pipeline_mode = #tpu.pipeline_mode<synchronous>, transform_indices = @transform_6, window_bounds = array<i64: 1, 128>}, {pipeline_mode = #tpu.pipeline_mode<synchronous>, transform_indices = @transform_7, window_bounds = array<i64: 128, 128>}, {pipeline_mode = #tpu.pipeline_mode<synchronous>, transform_indices = @transform_8, window_bounds = array<i64: 1, 128>}, {pipeline_mode = #tpu.pipeline_mode<synchronous>, transform_indices = @transform_9, window_bounds = array<i64: 128, 128>}, {pipeline_mode = #tpu.pipeline_mode<synchronous>, transform_indices = @transform_10, window_bounds = array<i64: 1, 128>}, {pipeline_mode = #tpu.pipeline_mode<synchronous>, transform_indices = @transform_11, window_bounds = array<i64: 256, 512>}, {pipeline_mode = #tpu.pipeline_mode<synchronous>, transform_indices = @transform_12, window_bounds = array<i64: 1, 512>}, {pipeline_mode = #tpu.pipeline_mode<synchronous>, transform_indices = @transform_13, window_bounds = array<i64: 128, 128>}, {pipeline_mode = #tpu.pipeline_mode<synchronous>, transform_indices = @transform_14, window_bounds = array<i64: 1, 128>}, {pipeline_mode = #tpu.pipeline_mode<synchronous>, transform_indices = @transform_15, window_bounds = array<i64: 2, 128>}, {pipeline_mode = #tpu.pipeline_mode<synchronous>, transform_indices = @transform_16, window_bounds = array<i64: 2, 128>}, {transform_indices = @transform_17, window_bounds = array<i64: 1, 2, 128>}, {pipeline_mode = #tpu.pipeline_mode<synchronous>, transform_indices = @transform_18, window_bounds = array<i64: 2, 128>}, {pipeline_mode = #tpu.pipeline_mode<synchronous>, transform_indices = @transform_19, window_bounds = array<i64: 2, 128>}]} {
    %c0_i32 = arith.constant 0 : i32
    %0 = arith.cmpi eq, %arg0, %c0_i32 : i32
    %1 = arith.extui %0 : i1 to i32
    %c0_i32_0 = arith.constant 0 : i32
    %2 = arith.cmpi ne, %1, %c0_i32_0 : i32
    scf.if %2 {
      %c0_63 = arith.constant 0 : index
      %c0_64 = arith.constant 0 : index
      %104 = vector.load %arg16[%c0_63, %c0_64] : memref<2x128xf32, #tpu.memory_space<vmem>>, vector<2x128xf32>
      %c0_65 = arith.constant 0 : index
      %c0_66 = arith.constant 0 : index
      %105 = vector.load %arg21[%c0_65, %c0_66] : memref<2x128xf32, #tpu.memory_space<vmem>>, vector<2x128xf32>
      tpu.vector_store %arg21[%c0_65, %c0_66], %104 {strides = array<i32>} : memref<2x128xf32, #tpu.memory_space<vmem>>, vector<2x128xf32>,
      %c0_67 = arith.constant 0 : index
      %c0_68 = arith.constant 0 : index
      %106 = vector.load %arg17[%c0_67, %c0_68] : memref<2x128xf32, #tpu.memory_space<vmem>>, vector<2x128xf32>
      %c0_69 = arith.constant 0 : index
      %c0_70 = arith.constant 0 : index
      %107 = vector.load %arg22[%c0_69, %c0_70] : memref<2x128xf32, #tpu.memory_space<vmem>>, vector<2x128xf32>
      tpu.vector_store %arg22[%c0_69, %c0_70], %106 {strides = array<i32>} : memref<2x128xf32, #tpu.memory_space<vmem>>, vector<2x128xf32>,
    } else {
    }
    %c0 = arith.constant 0 : index
    %c0_1 = arith.constant 0 : index
    %c0_2 = arith.constant 0 : index
    %3 = vector.load %arg1[%c0, %c0_1, %c0_2] : memref<1x2x512xf32, #tpu.memory_space<vmem>>, vector<1x2x512xf32>
    %4 = vector.shape_cast %3 : vector<1x2x512xf32> to vector<2x512xf32>
    %5 = arith.truncf %4 : vector<2x512xf32> to vector<2x512xbf16>
    %c0_3 = arith.constant 0 : index
    %c0_4 = arith.constant 0 : index
    %6 = vector.load %arg2[%c0_3, %c0_4] : memref<512x1024xbf16, #tpu.memory_space<vmem>>, vector<512x1024xbf16>
    %cst = arith.constant dense<0.000000e+00> : vector<2x1024xf32>
    %7 = tpu.matmul %5, %6, %cst {dimension_numbers = #tpu.dot_dimension_numbers<[1], [0], [0], [1], [0, 0, 1, 1], [], []>} : vector<2x512xbf16>, vector<512x1024xbf16>, vector<2x1024xf32> -> vector<2x1024xf32>
    %cst_5 = arith.constant 0.000000e+00 : f32
    %8 = vector.broadcast %cst_5 : f32 to vector<2x1024xf32>
    %9 = arith.maximumf %7, %8 : vector<2x1024xf32>
    %c0_6 = arith.constant 0 : index
    %c0_7 = arith.constant 0 : index
    %10 = vector.load %arg5[%c0_6, %c0_7] : memref<1x128xf32, #tpu.memory_space<vmem>>, vector<1x128xf32>
    %11 = vector.extract_strided_slice %9 {offsets = [0, 0], sizes = [2, 512], strides = [1, 1]} : vector<2x1024xf32> to vector<2x512xf32>
    %12 = arith.truncf %11 : vector<2x512xf32> to vector<2x512xbf16>
    %c0_8 = arith.constant 0 : index
    %c0_9 = arith.constant 0 : index
    %13 = vector.load %arg3[%c0_8, %c0_9] : memref<512x128xbf16, #tpu.memory_space<vmem>>, vector<512x128xbf16>
    %cst_10 = arith.constant dense<0.000000e+00> : vector<2x128xf32>
    %14 = tpu.matmul %12, %13, %cst_10 {dimension_numbers = #tpu.dot_dimension_numbers<[1], [0], [0], [1], [0, 0, 1, 1], [], []>} : vector<2x512xbf16>, vector<512x128xbf16>, vector<2x128xf32> -> vector<2x128xf32>
    %15 = vector.broadcast %10 : vector<1x128xf32> to vector<2x128xf32>
    %16 = arith.addf %14, %15 : vector<2x128xf32>
    %17 = vector.extract_strided_slice %9 {offsets = [0, 256], sizes = [2, 768], strides = [1, 1]} : vector<2x1024xf32> to vector<2x768xf32>
    %18 = arith.truncf %17 : vector<2x768xf32> to vector<2x768xbf16>
    %c0_11 = arith.constant 0 : index
    %c0_12 = arith.constant 0 : index
    %19 = vector.load %arg4[%c0_11, %c0_12] : memref<768x128xbf16, #tpu.memory_space<vmem>>, vector<768x128xbf16>
    %cst_13 = arith.constant dense<0.000000e+00> : vector<2x128xf32>
    %20 = tpu.matmul %18, %19, %cst_13 {dimension_numbers = #tpu.dot_dimension_numbers<[1], [0], [0], [1], [0, 0, 1, 1], [], []>} : vector<2x768xbf16>, vector<768x128xbf16>, vector<2x128xf32> -> vector<2x128xf32>
    %21 = vector.broadcast %10 : vector<1x128xf32> to vector<2x128xf32>
    %22 = arith.addf %20, %21 : vector<2x128xf32>
    %cst_14 = arith.constant 0.000000e+00 : f32
    %23 = vector.broadcast %cst_14 : f32 to vector<2x128xf32>
    %24 = arith.maximumf %16, %23 : vector<2x128xf32>
    %cst_15 = arith.constant 0.000000e+00 : f32
    %25 = vector.broadcast %cst_15 : f32 to vector<2x128xf32>
    %26 = arith.maximumf %22, %25 : vector<2x128xf32>
    %27 = tpu.concatenate %24, %26 in 1 : vector<2x128xf32>, vector<2x128xf32> -> vector<2x256xf32>
    %28 = arith.truncf %27 : vector<2x256xf32> to vector<2x256xbf16>
    %c0_16 = arith.constant 0 : index
    %c0_17 = arith.constant 0 : index
    %29 = vector.load %arg6[%c0_16, %c0_17] : memref<256x128xbf16, #tpu.memory_space<vmem>>, vector<256x128xbf16>
    %cst_18 = arith.constant dense<0.000000e+00> : vector<2x128xf32>
    %30 = tpu.matmul %28, %29, %cst_18 {dimension_numbers = #tpu.dot_dimension_numbers<[1], [0], [0], [1], [0, 0, 1, 1], [], []>} : vector<2x256xbf16>, vector<256x128xbf16>, vector<2x128xf32> -> vector<2x128xf32>
    %c0_19 = arith.constant 0 : index
    %c0_20 = arith.constant 0 : index
    %31 = vector.load %arg7[%c0_19, %c0_20] : memref<1x128xf32, #tpu.memory_space<vmem>>, vector<1x128xf32>
    %32 = vector.broadcast %31 : vector<1x128xf32> to vector<2x128xf32>
    %33 = arith.addf %30, %32 : vector<2x128xf32>
    %cst_21 = arith.constant 0.000000e+00 : f32
    %34 = vector.broadcast %cst_21 : f32 to vector<2x128xf32>
    %35 = arith.maximumf %33, %34 : vector<2x128xf32>
    %36 = arith.truncf %35 : vector<2x128xf32> to vector<2x128xbf16>
    %c0_22 = arith.constant 0 : index
    %c0_23 = arith.constant 0 : index
    %37 = vector.load %arg8[%c0_22, %c0_23] : memref<128x128xbf16, #tpu.memory_space<vmem>>, vector<128x128xbf16>
    %cst_24 = arith.constant dense<0.000000e+00> : vector<2x128xf32>
    %38 = tpu.matmul %36, %37, %cst_24 {dimension_numbers = #tpu.dot_dimension_numbers<[1], [0], [0], [1], [0, 0, 1, 1], [], []>} : vector<2x128xbf16>, vector<128x128xbf16>, vector<2x128xf32> -> vector<2x128xf32>
    %c0_25 = arith.constant 0 : index
    %c0_26 = arith.constant 0 : index
    %39 = vector.load %arg9[%c0_25, %c0_26] : memref<1x128xf32, #tpu.memory_space<vmem>>, vector<1x128xf32>
    %40 = vector.broadcast %39 : vector<1x128xf32> to vector<2x128xf32>
    %41 = arith.addf %38, %40 : vector<2x128xf32>
    %cst_27 = arith.constant 0.000000e+00 : f32
    %42 = vector.broadcast %cst_27 : f32 to vector<2x128xf32>
    %43 = arith.maximumf %41, %42 : vector<2x128xf32>
    %44 = arith.truncf %43 : vector<2x128xf32> to vector<2x128xbf16>
    %c0_28 = arith.constant 0 : index
    %c0_29 = arith.constant 0 : index
    %45 = vector.load %arg10[%c0_28, %c0_29] : memref<128x128xbf16, #tpu.memory_space<vmem>>, vector<128x128xbf16>
    %cst_30 = arith.constant dense<0.000000e+00> : vector<2x128xf32>
    %46 = tpu.matmul %44, %45, %cst_30 {dimension_numbers = #tpu.dot_dimension_numbers<[1], [0], [0], [1], [0, 0, 1, 1], [], []>} : vector<2x128xbf16>, vector<128x128xbf16>, vector<2x128xf32> -> vector<2x128xf32>
    %c0_31 = arith.constant 0 : index
    %c0_32 = arith.constant 0 : index
    %47 = vector.load %arg11[%c0_31, %c0_32] : memref<1x128xf32, #tpu.memory_space<vmem>>, vector<1x128xf32>
    %48 = vector.broadcast %47 : vector<1x128xf32> to vector<2x128xf32>
    %49 = arith.addf %46, %48 : vector<2x128xf32>
    %c0_33 = arith.constant 0 : index
    %c0_34 = arith.constant 0 : index
    %50 = vector.load %arg21[%c0_33, %c0_34] : memref<2x128xf32, #tpu.memory_space<vmem>>, vector<2x128xf32>
    %c0_35 = arith.constant 0 : index
    %c0_36 = arith.constant 0 : index
    %51 = vector.load %arg22[%c0_35, %c0_36] : memref<2x128xf32, #tpu.memory_space<vmem>>, vector<2x128xf32>
    %52 = tpu.concatenate %49, %50 in 1 : vector<2x128xf32>, vector<2x128xf32> -> vector<2x256xf32>
    %53 = arith.truncf %52 : vector<2x256xf32> to vector<2x256xbf16>
    %c0_37 = arith.constant 0 : index
    %c0_38 = arith.constant 0 : index
    %54 = vector.load %arg12[%c0_37, %c0_38] : memref<256x512xbf16, #tpu.memory_space<vmem>>, vector<256x512xbf16>
    %cst_39 = arith.constant dense<0.000000e+00> : vector<2x512xf32>
    %55 = tpu.matmul %53, %54, %cst_39 {dimension_numbers = #tpu.dot_dimension_numbers<[1], [0], [0], [1], [0, 0, 1, 1], [], []>} : vector<2x256xbf16>, vector<256x512xbf16>, vector<2x512xf32> -> vector<2x512xf32>
    %c0_40 = arith.constant 0 : index
    %c0_41 = arith.constant 0 : index
    %56 = vector.load %arg13[%c0_40, %c0_41] : memref<1x512xf32, #tpu.memory_space<vmem>>, vector<1x512xf32>
    %57 = vector.broadcast %56 : vector<1x512xf32> to vector<2x512xf32>
    %58 = arith.addf %55, %57 : vector<2x512xf32>
    %59 = vector.extract_strided_slice %58 {offsets = [0, 0], sizes = [2, 128], strides = [1, 1]} : vector<2x512xf32> to vector<2x128xf32>
    %60 = arith.negf %59 : vector<2x128xf32>
    %61 = math.exp %60 : vector<2x128xf32>
    %cst_42 = arith.constant 1.000000e+00 : f32
    %62 = vector.broadcast %cst_42 : f32 to vector<2x128xf32>
    %63 = arith.addf %62, %61 : vector<2x128xf32>
    %64 = arith.divf %62, %63 : vector<2x128xf32>
    %65 = vector.extract_strided_slice %58 {offsets = [0, 128], sizes = [2, 128], strides = [1, 1]} : vector<2x512xf32> to vector<2x128xf32>
    %66 = arith.negf %65 : vector<2x128xf32>
    %67 = math.exp %66 : vector<2x128xf32>
    %cst_43 = arith.constant 1.000000e+00 : f32
    %68 = vector.broadcast %cst_43 : f32 to vector<2x128xf32>
    %69 = arith.addf %68, %67 : vector<2x128xf32>
    %70 = arith.divf %68, %69 : vector<2x128xf32>
    %71 = vector.extract_strided_slice %58 {offsets = [0, 256], sizes = [2, 128], strides = [1, 1]} : vector<2x512xf32> to vector<2x128xf32>
    %72 = math.tanh %71 : vector<2x128xf32>
    %73 = vector.extract_strided_slice %58 {offsets = [0, 384], sizes = [2, 128], strides = [1, 1]} : vector<2x512xf32> to vector<2x128xf32>
    %74 = arith.negf %73 : vector<2x128xf32>
    %75 = math.exp %74 : vector<2x128xf32>
    %cst_44 = arith.constant 1.000000e+00 : f32
    %76 = vector.broadcast %cst_44 : f32 to vector<2x128xf32>
    %77 = arith.addf %76, %75 : vector<2x128xf32>
    %78 = arith.divf %76, %77 : vector<2x128xf32>
    %79 = arith.mulf %70, %51 : vector<2x128xf32>
    %80 = arith.mulf %64, %72 : vector<2x128xf32>
    %81 = arith.addf %79, %80 : vector<2x128xf32>
    %82 = math.tanh %81 : vector<2x128xf32>
    %83 = arith.mulf %78, %82 : vector<2x128xf32>
    %cst_45 = arith.constant 0.000000e+00 : f32
    %84 = vector.broadcast %cst_45 : f32 to vector<2x128xf32>
    %85 = arith.maximumf %83, %84 : vector<2x128xf32>
    %86 = arith.truncf %85 : vector<2x128xf32> to vector<2x128xbf16>
    %c0_46 = arith.constant 0 : index
    %c0_47 = arith.constant 0 : index
    %87 = vector.load %arg14[%c0_46, %c0_47] : memref<128x128xbf16, #tpu.memory_space<vmem>>, vector<128x128xbf16>
    %cst_48 = arith.constant dense<0.000000e+00> : vector<2x128xf32>
    %88 = tpu.matmul %86, %87, %cst_48 {dimension_numbers = #tpu.dot_dimension_numbers<[1], [0], [0], [1], [0, 0, 1, 1], [], []>} : vector<2x128xbf16>, vector<128x128xbf16>, vector<2x128xf32> -> vector<2x128xf32>
    %c0_49 = arith.constant 0 : index
    %c0_50 = arith.constant 0 : index
    %89 = vector.load %arg15[%c0_49, %c0_50] : memref<1x128xf32, #tpu.memory_space<vmem>>, vector<1x128xf32>
    %90 = vector.broadcast %89 : vector<1x128xf32> to vector<2x128xf32>
    %91 = arith.addf %88, %90 : vector<2x128xf32>
    %92 = arith.negf %91 : vector<2x128xf32>
    %93 = math.exp %92 : vector<2x128xf32>
    %cst_51 = arith.constant 1.000000e+00 : f32
    %94 = vector.broadcast %cst_51 : f32 to vector<2x128xf32>
    %95 = arith.addf %94, %93 : vector<2x128xf32>
    %96 = arith.divf %94, %95 : vector<2x128xf32>
    %c0_52 = arith.constant 0 : index
    %c0_53 = arith.constant 0 : index
    %97 = vector.load %arg21[%c0_52, %c0_53] : memref<2x128xf32, #tpu.memory_space<vmem>>, vector<2x128xf32>
    tpu.vector_store %arg21[%c0_52, %c0_53], %83 {strides = array<i32>} : memref<2x128xf32, #tpu.memory_space<vmem>>, vector<2x128xf32>,
    %c0_54 = arith.constant 0 : index
    %c0_55 = arith.constant 0 : index
    %98 = vector.load %arg22[%c0_54, %c0_55] : memref<2x128xf32, #tpu.memory_space<vmem>>, vector<2x128xf32>
    tpu.vector_store %arg22[%c0_54, %c0_55], %81 {strides = array<i32>} : memref<2x128xf32, #tpu.memory_space<vmem>>, vector<2x128xf32>,
    %c0_56 = arith.constant 0 : index
    %c0_57 = arith.constant 0 : index
    %c0_58 = arith.constant 0 : index
    %99 = vector.load %arg18[%c0_56, %c0_57, %c0_58] : memref<1x2x128xf32, #tpu.memory_space<vmem>>, vector<1x2x128xf32>
    %100 = vector.shape_cast %99 : vector<1x2x128xf32> to vector<2x128xf32>
    %101 = vector.shape_cast %96 : vector<2x128xf32> to vector<1x2x128xf32>
    tpu.vector_store %arg18[%c0_56, %c0_57, %c0_58], %101 {strides = array<i32>} : memref<1x2x128xf32, #tpu.memory_space<vmem>>, vector<1x2x128xf32>,
    %c0_59 = arith.constant 0 : index
    %c0_60 = arith.constant 0 : index
    %102 = vector.load %arg19[%c0_59, %c0_60] : memref<2x128xf32, #tpu.memory_space<vmem>>, vector<2x128xf32>
    tpu.vector_store %arg19[%c0_59, %c0_60], %83 {strides = array<i32>} : memref<2x128xf32, #tpu.memory_space<vmem>>, vector<2x128xf32>,
    %c0_61 = arith.constant 0 : index
    %c0_62 = arith.constant 0 : index
    %103 = vector.load %arg20[%c0_61, %c0_62] : memref<2x128xf32, #tpu.memory_space<vmem>>, vector<2x128xf32>
    tpu.vector_store %arg20[%c0_61, %c0_62], %81 {strides = array<i32>} : memref<2x128xf32, #tpu.memory_space<vmem>>, vector<2x128xf32>,
    return
  }
  func.func @transform_0(%arg0: i32) -> (i32, i32, i32) {
    %c0_i32 = arith.constant 0 : i32
    %c0_i32_0 = arith.constant 0 : i32
    %c0_i32_1 = arith.constant 0 : i32
    return %arg0, %c0_i32, %c0_i32_0 : i32, i32, i32
  }
  func.func @transform_1(%arg0: i32) -> (i32, i32) {
    %c0_i32 = arith.constant 0 : i32
    %c0_i32_0 = arith.constant 0 : i32
    %c0_i32_1 = arith.constant 0 : i32
    return %c0_i32, %c0_i32_0 : i32, i32
  }
  func.func @transform_2(%arg0: i32) -> (i32, i32) {
    %c0_i32 = arith.constant 0 : i32
    %c0_i32_0 = arith.constant 0 : i32
    %c0_i32_1 = arith.constant 0 : i32
    return %c0_i32, %c0_i32_0 : i32, i32
  }
  func.func @transform_3(%arg0: i32) -> (i32, i32) {
    %c0_i32 = arith.constant 0 : i32
    %c0_i32_0 = arith.constant 0 : i32
    %c0_i32_1 = arith.constant 0 : i32
    return %c0_i32, %c0_i32_0 : i32, i32
  }
  func.func @transform_4(%arg0: i32) -> (i32, i32) {
    %c0_i32 = arith.constant 0 : i32
    %c0_i32_0 = arith.constant 0 : i32
    %c0_i32_1 = arith.constant 0 : i32
    return %c0_i32, %c0_i32_0 : i32, i32
  }
  func.func @transform_5(%arg0: i32) -> (i32, i32) {
    %c0_i32 = arith.constant 0 : i32
    %c0_i32_0 = arith.constant 0 : i32
    %c0_i32_1 = arith.constant 0 : i32
    return %c0_i32, %c0_i32_0 : i32, i32
  }
  func.func @transform_6(%arg0: i32) -> (i32, i32) {
    %c0_i32 = arith.constant 0 : i32
    %c0_i32_0 = arith.constant 0 : i32
    %c0_i32_1 = arith.constant 0 : i32
    return %c0_i32, %c0_i32_0 : i32, i32
  }
  func.func @transform_7(%arg0: i32) -> (i32, i32) {
    %c0_i32 = arith.constant 0 : i32
    %c0_i32_0 = arith.constant 0 : i32
    %c0_i32_1 = arith.constant 0 : i32
    return %c0_i32, %c0_i32_0 : i32, i32
  }
  func.func @transform_8(%arg0: i32) -> (i32, i32) {
    %c0_i32 = arith.constant 0 : i32
    %c0_i32_0 = arith.constant 0 : i32
    %c0_i32_1 = arith.constant 0 : i32
    return %c0_i32, %c0_i32_0 : i32, i32
  }
  func.func @transform_9(%arg0: i32) -> (i32, i32) {
    %c0_i32 = arith.constant 0 : i32
    %c0_i32_0 = arith.constant 0 : i32
    %c0_i32_1 = arith.constant 0 : i32
    return %c0_i32, %c0_i32_0 : i32, i32
  }
  func.func @transform_10(%arg0: i32) -> (i32, i32) {
    %c0_i32 = arith.constant 0 : i32
    %c0_i32_0 = arith.constant 0 : i32
    %c0_i32_1 = arith.constant 0 : i32
    return %c0_i32, %c0_i32_0 : i32, i32
  }
  func.func @transform_11(%arg0: i32) -> (i32, i32) {
    %c0_i32 = arith.constant 0 : i32
    %c0_i32_0 = arith.constant 0 : i32
    %c0_i32_1 = arith.constant 0 : i32
    return %c0_i32, %c0_i32_0 : i32, i32
  }
  func.func @transform_12(%arg0: i32) -> (i32, i32) {
    %c0_i32 = arith.constant 0 : i32
    %c0_i32_0 = arith.constant 0 : i32
    %c0_i32_1 = arith.constant 0 : i32
    return %c0_i32, %c0_i32_0 : i32, i32
  }
  func.func @transform_13(%arg0: i32) -> (i32, i32) {
    %c0_i32 = arith.constant 0 : i32
    %c0_i32_0 = arith.constant 0 : i32
    %c0_i32_1 = arith.constant 0 : i32
    return %c0_i32, %c0_i32_0 : i32, i32
  }
  func.func @transform_14(%arg0: i32) -> (i32, i32) {
    %c0_i32 = arith.constant 0 : i32
    %c0_i32_0 = arith.constant 0 : i32
    %c0_i32_1 = arith.constant 0 : i32
    return %c0_i32, %c0_i32_0 : i32, i32
  }
  func.func @transform_15(%arg0: i32) -> (i32, i32) {
    %c0_i32 = arith.constant 0 : i32
    %c0_i32_0 = arith.constant 0 : i32
    %c0_i32_1 = arith.constant 0 : i32
    return %c0_i32, %c0_i32_0 : i32, i32
  }
  func.func @transform_16(%arg0: i32) -> (i32, i32) {
    %c0_i32 = arith.constant 0 : i32
    %c0_i32_0 = arith.constant 0 : i32
    %c0_i32_1 = arith.constant 0 : i32
    return %c0_i32, %c0_i32_0 : i32, i32
  }
  func.func @transform_17(%arg0: i32) -> (i32, i32, i32) {
    %c0_i32 = arith.constant 0 : i32
    %c0_i32_0 = arith.constant 0 : i32
    %c0_i32_1 = arith.constant 0 : i32
    return %arg0, %c0_i32, %c0_i32_0 : i32, i32, i32
  }
  func.func @transform_18(%arg0: i32) -> (i32, i32) {
    %c0_i32 = arith.constant 0 : i32
    %c0_i32_0 = arith.constant 0 : i32
    %c0_i32_1 = arith.constant 0 : i32
    return %c0_i32, %c0_i32_0 : i32, i32
  }
  func.func @transform_19(%arg0: i32) -> (i32, i32) {
    %c0_i32 = arith.constant 0 : i32
    %c0_i32_0 = arith.constant 0 : i32
    %c0_i32_1 = arith.constant 0 : i32
    return %c0_i32, %c0_i32_0 : i32, i32
  }
}

</mosaic_0001>

<bundles_post_ra>
// kernel: _silero_vad_pallas.1
= control target key start
LH: loop header
LB: loop body
LE: loop exit
PB: predicated region body
PF: predicated region fallthrough
CT: control target
= control target key end

     0   :  { %s5477_s0 = inlined_call_operand.vmem [shape: f32[1,2,512], index: 0, kind: input, shape index: {}]   ;;  %s5478_s1 = inlined_call_operand.hbm [shape: bf16[512,1024], index: 1, kind: input, shape index: {}]   ;;  %s5479_s2 = inlined_call_operand.hbm [shape: bf16[512,128], index: 2, kind: input, shape index: {}]   ;;  %s5480_s3 = inlined_call_operand.hbm [shape: bf16[768,128], index: 3, kind: input, shape index: {}]   ;;  %s5481_s4 = inlined_call_operand.vmem [shape: f32[1,128], index: 4, kind: input, shape index: {}]   ;;  %s5482_s5 = inlined_call_operand.hbm [shape: bf16[256,128], index: 5, kind: input, shape index: {}]   ;;  %s5483_s6 = inlined_call_operand.vmem [shape: f32[1,128], index: 6, kind: input, shape index: {}]   ;;  %s5484_s7 = inlined_call_operand.hbm [shape: bf16[128,128], index: 7, kind: input, shape index: {}]   ;;  %s5485_s8 = inlined_call_operand.vmem [shape: f32[1,128], index: 8, kind: input, shape index: {}]   ;;  %s5486_s9 = inlined_call_operand.hbm [shape: bf16[128,128], index: 9, kind: input, shape index: {}]   ;;  %s5487_s10 = inlined_call_operand.vmem [shape: f32[1,128], index: 10, kind: input, shape index: {}]   ;;  %s5488_s11 = inlined_call_operand.hbm [shape: bf16[256,512], index: 11, kind: input, shape index: {}]   ;;  %s5489_s12 = inlined_call_operand.vmem [shape: f32[1,512], index: 12, kind: input, shape index: {}]   ;;  %s5490_s13 = inlined_call_operand.hbm [shape: bf16[128,128], index: 13, kind: input, shape index: {}]   ;;  %s5491_s14 = inlined_call_operand.vmem [shape: f32[1,128], index: 14, kind: input, shape index: {}]   ;;  %s5492_s15 = inlined_call_operand.vmem [shape: f32[2,128], index: 15, kind: input, shape index: {}, may-alias: {15,18}]   ;;  %s5493_s16 = inlined_call_operand.vmem [shape: f32[2,128], index: 16, kind: input, shape index: {}, may-alias: {16,19}]   ;;  %s5494_s17 = inlined_call_operand.vmem [shape: f32[1,2,128], index: 17, kind: output, shape index: {0}]   ;;  %s5495_s18 = inlined_call_operand.vmem [shape: f32[2,128], index: 18, kind: output, shape index: {1}, may-alias: {15,18}]   ;;  %s5496_s19 = inlined_call_operand.vmem [shape: f32[2,128], index: 19, kind: output, shape index: {2}, may-alias: {16,19}]  }
   0x1   :  { %5502 = sst [smem:[#allocation22_spill]] %s5477_s0 }
   0x2   :  { %5503 = sst [smem:[#allocation23_spill]] %s5478_s1 }
   0x3   :  { %5504 = sst [smem:[#allocation24_spill]] %s5479_s2 }
   0x4   :  { %5505 = sst [smem:[#allocation25_spill]] %s5480_s3 }
   0x5   :  { %5506 = sst [smem:[#allocation26_spill]] %s5491_s14 }
   0x6   :  { %5507 = sst [smem:[#allocation27_spill]] %s5494_s17 }
   0x7   :  { %25 = vsyncpa [#allocation5], 0 }
   0x8   :  { %26 = vsyncpa [#allocation7], 0 }
   0x9   :  { %27 = vsyncpa [#allocation10], 0 }
   0xa   :  { %28 = vsyncpa [#allocation13], 0 }
   0xb   :  { %29 = vsyncpa [#allocation16], 0  ;;  %s5117_s0 = smov [#allocation6]   ;;  %s5508_s1 = sld [smem:[#allocation24_spill]] }
   0xc   :  { %s49_s30 = sshll.u32 %s5117_s0, 4  ;;  %s50_s30 = int_to_ptr.vmem [resolvable:$true] %s49_s30 }
  0x11   :  { %s4931_s22 = scalar_lea.hbm %s5508_s1, 4096 }
  0x12   :  { %p4932_p0 = scmp.ne.s32.totalorder %s5508_s1, %s4931_s22  ;;  %p4935_p1 = scmp.lt.u32.totalorder %s4931_s22, %s5508_s1 }
  0x14   :  { %p4937_p2 = pnand %p4935_p1, %p4932_p0 }
  0x16   :  { %4940 = shalt.err (!%p4937_p2)
}
  0x17   :  { %s4941_s3 = scalar_lea.vmem %s50_s30, 4096  ;;  %p4946_p4 = scmp.lt.s32.totalorder %s50_s30, %s50_s30 }
  0x18   :  { %p4942_p3 = scmp.ne.s32.totalorder %s50_s30, %s4941_s3  ;;  %p4947_p5 = scmp.lt.s32.totalorder %s4941_s3, %s4941_s3 }
  0x1a   :  { %p4948_p6 = por %p4947_p5, %p4946_p4 }
  0x1c   :  { %p4949_p7 = pnand %p4948_p6, %p4942_p3 }
  0x1e   :  { %4952 = shalt.err (!%p4949_p7)
}
  0x1f   :  { %s5500_s26 = smov 64   ;;  %s5119_s27 = smov 4  }
  0x20   :  { %55 = dma.hbm_to_vmem [thread:$0]  %s5508_s1, 4096, %s50_s30, [#allocation7], %s5500_s26, %s5500_s26, %s5119_s27  }
  0x21   :  { %s5120_s0 = smov [#allocation9]   ;;  %s5121_s21 = smov [#allocation12]  }
  0x22   :  { %s75_s20 = sshll.u32 %s5120_s0, 4  ;;  %s103_s22 = sshll.u32 %s5121_s21, 4  ;;  %s76_s20 = int_to_ptr.vmem [resolvable:$true] %s75_s20  ;;  %s104_s22 = int_to_ptr.vmem [resolvable:$true] %s103_s22 }
  0x23   :  { %s4953_s24 = scalar_lea.hbm %s5482_s5, 2048 }
  0x24   :  { %p4954_p8 = scmp.ne.s32.totalorder %s5482_s5, %s4953_s24  ;;  %p4957_p9 = scmp.lt.u32.totalorder %s4953_s24, %s5482_s5 }
  0x26   :  { %p4959_p10 = pnand %p4957_p9, %p4954_p8 }
  0x28   :  { %4962 = shalt.err (!%p4959_p10)
}
  0x29   :  { %s4963_s30 = scalar_lea.vmem %s76_s20, 2048  ;;  %p4968_p12 = scmp.lt.s32.totalorder %s76_s20, %s76_s20 }
  0x2a   :  { %p4964_p11 = scmp.ne.s32.totalorder %s76_s20, %s4963_s30  ;;  %p4969_p13 = scmp.lt.s32.totalorder %s4963_s30, %s4963_s30 }
  0x2c   :  { %p4970_p0 = por %p4969_p13, %p4968_p12 }
  0x2e   :  { %p4971_p1 = pnand %p4970_p0, %p4964_p11 }
  0x30   :  { %4974 = shalt.err (!%p4971_p1)
}
  0x31   :  { %81 = dma.hbm_to_vmem [thread:$0]  %s5482_s5, 2048, %s76_s20, [#allocation10], %s5500_s26, %s5500_s26, %s5119_s27  }
  0x32   :  { %s4975_s17 = scalar_lea.hbm %s5486_s9, 1024 }
  0x33   :  { %p4976_p2 = scmp.ne.s32.totalorder %s5486_s9, %s4975_s17  ;;  %p4979_p3 = scmp.lt.u32.totalorder %s4975_s17, %s5486_s9 }
  0x35   :  { %p4981_p4 = pnand %p4979_p3, %p4976_p2 }
  0x37   :  { %4984 = shalt.err (!%p4981_p4)
}
  0x38   :  { %s4985_s24 = scalar_lea.vmem %s104_s22, 1024  ;;  %p4990_p6 = scmp.lt.s32.totalorder %s104_s22, %s104_s22 }
  0x39   :  { %p4986_p5 = scmp.ne.s32.totalorder %s104_s22, %s4985_s24  ;;  %p4991_p7 = scmp.lt.s32.totalorder %s4985_s24, %s4985_s24 }
  0x3b   :  { %p4992_p8 = por %p4991_p7, %p4990_p6 }
  0x3d   :  { %p4993_p9 = pnand %p4992_p8, %p4986_p5 }
  0x3f   :  { %4996 = shalt.err (!%p4993_p9)
}
  0x40   :  { %109 = dma.hbm_to_vmem [thread:$0]  %s5486_s9, 1024, %s104_s22, [#allocation13], %s5500_s26, %s5500_s26, %s5119_s27  }
  0x41   :  { %s5122_s25 = smov [#allocation4]   ;;  %s5509_s28 = sld [smem:[#allocation23_spill]] }
  0x42   :  { %s37_s3 = sshll.u32 %s5122_s25, 4  ;;  %s38_s3 = int_to_ptr.vmem [resolvable:$true] %s37_s3 }
  0x47   :  { %s4997_s29 = scalar_lea.hbm %s5509_s28, 32768 }
  0x48   :  { %p4998_p10 = scmp.ne.s32.totalorder %s5509_s28, %s4997_s29  ;;  %p5001_p11 = scmp.lt.u32.totalorder %s4997_s29, %s5509_s28 }
  0x4a   :  { %p5003_p12 = pnand %p5001_p11, %p4998_p10 }
  0x4c   :  { %5006 = shalt.err (!%p5003_p12)
}
  0x4d   :  { %s5007_s2 = scalar_lea.vmem %s38_s3, 32768  ;;  %p5012_p0 = scmp.lt.s32.totalorder %s38_s3, %s38_s3 }
  0x4e   :  { %p5008_p13 = scmp.ne.s32.totalorder %s38_s3, %s5007_s2  ;;  %p5013_p1 = scmp.lt.s32.totalorder %s5007_s2, %s5007_s2 }
  0x50   :  { %p5014_p2 = por %p5013_p1, %p5012_p0 }
  0x52   :  { %p5015_p3 = pnand %p5014_p2, %p5008_p13 }
  0x54   :  { %5018 = shalt.err (!%p5015_p3)
}
  0x55   :  { %s5123_s9 = smov 512   ;;  %s5124_s22 = smov 32  }
  0x56   :  { %43 = dma.hbm_to_vmem [thread:$0]  %s5509_s28, 32768, %s38_s3, [#allocation5], %s5123_s9, %s5123_s9, %s5124_s22  }
  0x57   :  { %s5125_s5 = smov [#allocation8]   ;;  %s5126_s25 = smov [#allocation11]  }
  0x58   :  { %s61_s20 = sshll.u32 %s5125_s5, 4  ;;  %s89_s30 = sshll.u32 %s5126_s25, 4  ;;  %s62_s20 = int_to_ptr.vmem [resolvable:$true] %s61_s20  ;;  %s5291_s30 = int_to_ptr.vmem [resolvable:$true] %s89_s30 }
  0x59   :  { %s5510_s14 = sld [smem:[#allocation25_spill]] }
  0x5f   :  { %s5019_s17 = scalar_lea.hbm %s5510_s14, 6144 }
  0x60   :  { %p5020_p4 = scmp.ne.s32.totalorder %s5510_s14, %s5019_s17  ;;  %p5023_p5 = scmp.lt.u32.totalorder %s5019_s17, %s5510_s14 }
  0x62   :  { %p5025_p6 = pnand %p5023_p5, %p5020_p4 }
  0x64   :  { %5028 = shalt.err (!%p5025_p6)
}
  0x65   :  { %s5029_s3 = scalar_lea.vmem %s62_s20, 6144  ;;  %p5034_p8 = scmp.lt.s32.totalorder %s62_s20, %s62_s20 }
  0x66   :  { %p5030_p7 = scmp.ne.s32.totalorder %s62_s20, %s5029_s3  ;;  %p5035_p9 = scmp.lt.s32.totalorder %s5029_s3, %s5029_s3 }
  0x68   :  { %p5036_p10 = por %p5035_p9, %p5034_p8 }
  0x6a   :  { %p5037_p11 = pnand %p5036_p10, %p5030_p7 }
  0x6c   :  { %5040 = shalt.err (!%p5037_p11)
}
  0x6d   :  { %s5511_s28 = smov 64   ;;  %s5041_s26 = scalar_lea.hbm %s5484_s7, 1024 }
  0x6e   :  { %67 = dma.hbm_to_vmem [thread:$0]  %s5510_s14, 6144, %s62_s20, [#allocation7], %s5511_s28, %s5511_s28, %s5119_s27  }
  0x6f   :  { %p5042_p12 = scmp.ne.s32.totalorder %s5484_s7, %s5041_s26  ;;  %p5045_p13 = scmp.lt.u32.totalorder %s5041_s26, %s5484_s7 }
  0x71   :  { %p5047_p0 = pnand %p5045_p13, %p5042_p12 }
  0x73   :  { %5050 = shalt.err (!%p5047_p0)
}
  0x74   :  { %s5051_s17 = scalar_lea.vmem %s5291_s30, 1024  ;;  %p5056_p2 = scmp.lt.s32.totalorder %s5291_s30, %s5291_s30 }
  0x75   :  { %p5052_p1 = scmp.ne.s32.totalorder %s5291_s30, %s5051_s17  ;;  %p5057_p3 = scmp.lt.s32.totalorder %s5051_s17, %s5051_s17 }
  0x77   :  { %p5058_p4 = por %p5057_p3, %p5056_p2 }
  0x79   :  { %p5059_p5 = pnand %p5058_p4, %p5052_p1 }
  0x7b   :  { %5062 = shalt.err (!%p5059_p5)
}
  0x7c   :  { %95 = dma.hbm_to_vmem [thread:$0]  %s5484_s7, 1024, %s5291_s30, [#allocation10], %s5511_s28, %s5511_s28, %s5119_s27  }
  0x7d   :  { %s5127_s0 = smov [#allocation14]   ;;  %s5063_s9 = scalar_lea.hbm %s5488_s11, 8192 }
  0x7e   :  { %s117_s21 = sshll.u32 %s5127_s0, 4  ;;  %p5064_p6 = scmp.ne.s32.totalorder %s5488_s11, %s5063_s9  ;;  %s118_s21 = int_to_ptr.vmem [resolvable:$true] %s117_s21 }
  0x7f   :  { %p5067_p7 = scmp.lt.u32.totalorder %s5063_s9, %s5488_s11 }
  0x81   :  { %p5069_p8 = pnand %p5067_p7, %p5064_p6 }
  0x83   :  { %5072 = shalt.err (!%p5069_p8)
}
  0x84   :  { %s5073_s5 = scalar_lea.vmem %s118_s21, 8192  ;;  %p5078_p10 = scmp.lt.s32.totalorder %s118_s21, %s118_s21 }
  0x85   :  { %p5074_p9 = scmp.ne.s32.totalorder %s118_s21, %s5073_s5  ;;  %p5079_p11 = scmp.lt.s32.totalorder %s5073_s5, %s5073_s5 }
  0x87   :  { %p5080_p12 = por %p5079_p11, %p5078_p10 }
  0x89   :  { %p5081_p13 = pnand %p5080_p12, %p5074_p9 }
  0x8b   :  { %5084 = shalt.err (!%p5081_p13)
}
  0x8c   :  { %s5128_s7 = smov 256   ;;  %s5129_s30 = smov 16  }
  0x8d   :  { %123 = dma.hbm_to_vmem [thread:$0]  %s5488_s11, 8192, %s118_s21, [#allocation13], %s5128_s7, %s5128_s7, %s5129_s30  }
  0x8e   :  { %s5130_s29 = smov [#allocation15]   ;;  %s5085_s0 = scalar_lea.hbm %s5490_s13, 1024 }
  0x8f   :  { %s131_s17 = sshll.u32 %s5130_s29, 4  ;;  %p5086_p0 = scmp.ne.s32.totalorder %s5490_s13, %s5085_s0  ;;  %s132_s17 = int_to_ptr.vmem [resolvable:$true] %s131_s17 }
  0x90   :  { %p5089_p1 = scmp.lt.u32.totalorder %s5085_s0, %s5490_s13 }
  0x92   :  { %p5091_p2 = pnand %p5089_p1, %p5086_p0 }
  0x94   :  { %5094 = shalt.err (!%p5091_p2)
}
  0x95   :  { %s5095_s23 = scalar_lea.vmem %s132_s17, 1024  ;;  %p5100_p4 = scmp.lt.s32.totalorder %s132_s17, %s132_s17 }
  0x96   :  { %p5096_p3 = scmp.ne.s32.totalorder %s132_s17, %s5095_s23  ;;  %p5101_p5 = scmp.lt.s32.totalorder %s5095_s23, %s5095_s23 }
  0x98   :  { %p5102_p6 = por %p5101_p5, %p5100_p4 }
  0x9a   :  { %p5103_p7 = pnand %p5102_p6, %p5096_p3 }
  0x9c   :  { %5106 = shalt.err (!%p5103_p7)
}
  0x9d   :  { %137 = dma.hbm_to_vmem [thread:$0]  %s5490_s13, 1024, %s132_s17, [#allocation16], %s5511_s28, %s5511_s28, %s5119_s27  }
  0x9e   :  { %5107 = dma.done.wait [#allocation5], 32768  }
  0x9f   :  { %5108 = vsyncadd [#allocation5], 4294934528 }
  0xa0   :  { %5109 = dma.done.wait [#allocation7], 10240  }
  0xa1   :  { %5110 = vsyncadd [#allocation7], 4294957056 }
  0xa2   :  { %5111 = dma.done.wait [#allocation10], 3072  }
  0xa3   :  { %5112 = vsyncadd [#allocation10], 4294964224 }
  0xa4   :  { %5113 = dma.done.wait [#allocation13], 9216  }
  0xa5   :  { %5114 = vsyncadd [#allocation13], 4294958080 }
  0xa6   :  { %5115 = dma.done.wait [#allocation16], 1024  }
  0xa7   :  { %5116 = vsyncadd [#allocation16], 4294966272  ;;  %v204_v0 = vld [vmem:[#allocation4] sm:$0xff]  ;;  %v205_v2 = vld [vmem:[#allocation4 + $0x8] sm:$0xff]  ;;  %v5131_v32 = vmov 1983009808   ;;  %v183_v34 = vlaneseq }
  0xa8   :  { %v208_v1 = vld [vmem:[#allocation4 + $0x20] sm:$0xff]  ;;  %v209_v4 = vld [vmem:[#allocation4 + $0x28] sm:$0xff]  ;;  %v181_v33 = vunpack.c.l.s4 %v5131_v32  ;;  %s5512_s28 = sld [smem:[#allocation22_spill]]  ;;  %vm5133_vm0 = vmmov 0   ;;  %s5513_s3 = sld [smem:[#allocation26_spill]] }
  0xa9   :  { %v3994_v3 = vcombine.high %v204_v0, %v208_v1  ;;  %v3993_v5 = vcombine.low %v204_v0, %v208_v1  ;;  %v212_v6 = vld [vmem:[#allocation4 + $0x40] sm:$0xff]  ;;  %v3996_v8 = vcombine.high %v205_v2, %v209_v4  ;;  %v3995_v9 = vcombine.low %v205_v2, %v209_v4  ;;  %v213_v11 = vld [vmem:[#allocation4 + $0x48] sm:$0xff] }
  0xaa   :  { %v216_v7 = vld [vmem:[#allocation4 + $0x60] sm:$0xff]  ;;  %v217_v12 = vld [vmem:[#allocation4 + $0x68] sm:$0xff]  ;;  %v182_v43 = vunpack.c.0.s8 %v181_v33  ;;  %v5355_v44 = vshrl.u32 %v183_v34, 7 }
  0xab   :  { %v4002_v10 = vcombine.high %v212_v6, %v216_v7  ;;  %v220_v13 = vld [vmem:[#allocation4 + $0x80] sm:$0xff]  ;;  %1740 = vmatprep.subr.bf16.mxu0 %v3994_v3  ;;  %v4004_v14 = vcombine.high %v213_v11, %v217_v12  ;;  %v221_v16 = vld [vmem:[#allocation4 + $0x88] sm:$0xff]  ;;  %1822 = vmatprep.subr.bf16.mxu1 %v3996_v8  ;;  %v4001_v18 = vcombine.low %v212_v6, %v216_v7 }
  0xac   :  { %v224_v15 = vld [vmem:[#allocation4 + $0xa0] sm:$0xff]  ;;  %v225_v17 = vld [vmem:[#allocation4 + $0xa8] sm:$0xff]  ;;  %1741 = vmatpush1.bf16.msra.mxu0 %v3993_v5  ;;  %1823 = vmatpush1.bf16.msra.mxu1 %v3995_v9  ;;  %v4003_v19 = vcombine.low %v213_v11, %v217_v12  ;;  %v5358_v53 = vsub.s32 %v182_v43, %v5355_v44 }
  0xad   :  { %1742 = vmatprep.subr.bf16.mxu0 %v4002_v10  ;;  %v4010_v20 = vcombine.high %v220_v13, %v224_v15  ;;  %1824 = vmatprep.subr.bf16.mxu1 %v4004_v14  ;;  %v4012_v21 = vcombine.high %v221_v16, %v225_v17  ;;  %v228_v22 = vld [vmem:[#allocation4 + $0xc0] sm:$0xff]  ;;  %v229_v24 = vld [vmem:[#allocation4 + $0xc8] sm:$0xff]  ;;  %v4009_v26 = vcombine.low %v220_v13, %v224_v15 }
  0xae   :  { %v232_v23 = vld [vmem:[#allocation4 + $0xe0] sm:$0xff]  ;;  %v233_v25 = vld [vmem:[#allocation4 + $0xe8] sm:$0xff]  ;;  %v4011_v27 = vcombine.low %v221_v16, %v225_v17 }
  0xaf   :  { %v4018_v28 = vcombine.high %v228_v22, %v232_v23  ;;  %v4020_v29 = vcombine.high %v229_v24, %v233_v25  ;;  %v236_v30 = vld [vmem:[#allocation4 + $0x100] sm:$0xff]  ;;  %v237_v35 = vld [vmem:[#allocation4 + $0x108] sm:$0xff]  ;;  %v4017_v37 = vcombine.low %v228_v22, %v232_v23  ;;  %v4019_v38 = vcombine.low %v229_v24, %v233_v25 }
  0xb0   :  { %1743 = vmatpush1.bf16.msra.mxu0 %v4001_v18  ;;  %1825 = vmatpush1.bf16.msra.mxu1 %v4003_v19  ;;  %v240_v31 = vld [vmem:[#allocation4 + $0x120] sm:$0xff]  ;;  %v241_v36 = vld [vmem:[#allocation4 + $0x128] sm:$0xff] }
  0xb1   :  { %1744 = vmatprep.subr.bf16.mxu0 %v4010_v20  ;;  %1826 = vmatprep.subr.bf16.mxu1 %v4012_v21  ;;  %v4026_v39 = vcombine.high %v236_v30, %v240_v31  ;;  %v4028_v40 = vcombine.high %v237_v35, %v241_v36  ;;  %v244_v41 = vld [vmem:[#allocation4 + $0x140] sm:$0xff]  ;;  %v245_v45 = vld [vmem:[#allocation4 + $0x148] sm:$0xff]  ;;  %v4025_v47 = vcombine.low %v236_v30, %v240_v31 }
  0xb2   :  { %v248_v42 = vld [vmem:[#allocation4 + $0x160] sm:$0xff]  ;;  %v249_v46 = vld [vmem:[#allocation4 + $0x168] sm:$0xff]  ;;  %v4027_v48 = vcombine.low %v237_v35, %v241_v36 }
  0xb3   :  { %v4034_v49 = vcombine.high %v244_v41, %v248_v42  ;;  %v4036_v50 = vcombine.high %v245_v45, %v249_v46  ;;  %v252_v51 = vld [vmem:[#allocation4 + $0x180] sm:$0xff]  ;;  %v253_v54 = vld [vmem:[#allocation4 + $0x188] sm:$0xff]  ;;  %v4033_v56 = vcombine.low %v244_v41, %v248_v42  ;;  %v4035_v57 = vcombine.low %v245_v45, %v249_v46 }
  0xb4   :  { %1745 = vmatpush1.bf16.msra.mxu0 %v4009_v26  ;;  %1827 = vmatpush1.bf16.msra.mxu1 %v4011_v27  ;;  %v256_v52 = vld [vmem:[#allocation4 + $0x1a0] sm:$0xff]  ;;  %v257_v55 = vld [vmem:[#allocation4 + $0x1a8] sm:$0xff] }
  0xb5   :  { %1746 = vmatprep.subr.bf16.mxu0 %v4018_v28  ;;  %1828 = vmatprep.subr.bf16.mxu1 %v4020_v29  ;;  %v4042_v58 = vcombine.high %v252_v51, %v256_v52  ;;  %v5363_v59 = vld [vmem:[%s5512_s28] sm:$0xff]  ;;  %v4044_v60 = vcombine.high %v253_v54, %v257_v55  ;;  %v261_v0 = vld [vmem:[#allocation4 + $0x1c8] sm:$0xff]  ;;  %v4041_v2 = vcombine.low %v252_v51, %v256_v52 }
  0xb6   :  { %v260_v61 = vld [vmem:[#allocation4 + $0x1c0] sm:$0xff]  ;;  %v5367_v63 = vrot.slane %v5363_v59, %v5358_v53  ;;  %v265_v1 = vld [vmem:[#allocation4 + $0x1e8] sm:$0xff]  ;;  %v4043_v4 = vcombine.low %v253_v54, %v257_v55 }
  0xb7   :  { %v264_v62 = vld [vmem:[#allocation4 + $0x1e0] sm:$0xff]  ;;  %v4052_v6 = vcombine.high %v261_v0, %v265_v1  ;;  %v269_v10 = vld [vmem:[#allocation4 + $0x208] sm:$0xff]  ;;  %v4051_v13 = vcombine.low %v261_v0, %v265_v1 }
  0xb8   :  { %1747 = vmatpush1.bf16.msra.mxu0 %v4017_v37  ;;  %1829 = vmatpush1.bf16.msra.mxu1 %v4019_v38  ;;  %v194_v3 = vcombine.high %v5367_v63, %v5367_v63  ;;  %v4050_v5 = vcombine.high %v260_v61, %v264_v62  ;;  %v268_v7 = vld [vmem:[#allocation4 + $0x200] sm:$0xff]  ;;  %v273_v11 = vld [vmem:[#allocation4 + $0x228] sm:$0xff]  ;;  %v4049_v12 = vcombine.low %v260_v61, %v264_v62 }
  0xb9   :  { %1748 = vmatprep.subr.bf16.mxu0 %v4026_v39  ;;  %1830 = vmatprep.subr.bf16.mxu1 %v4028_v40  ;;  %v272_v8 = vld [vmem:[#allocation4 + $0x220] sm:$0xff]  ;;  %v4060_v15 = vcombine.high %v269_v10, %v273_v11  ;;  %v277_v18 = vld [vmem:[#allocation4 + $0x248] sm:$0xff]  ;;  %v4059_v21 = vcombine.low %v269_v10, %v273_v11 }
  0xba   :  { %v5371_v9 = vpack.c.bf16 %v194_v3, %v194_v3  ;;  %v4058_v14 = vcombine.high %v268_v7, %v272_v8  ;;  %v276_v16 = vld [vmem:[#allocation4 + $0x240] sm:$0xff]  ;;  %v281_v19 = vld [vmem:[#allocation4 + $0x268] sm:$0xff]  ;;  %v4057_v20 = vcombine.low %v268_v7, %v272_v8 }
  0xbb   :  { %v280_v17 = vld [vmem:[#allocation4 + $0x260] sm:$0xff]  ;;  %v4068_v23 = vcombine.high %v277_v18, %v281_v19  ;;  %v285_v26 = vld [vmem:[#allocation4 + $0x288] sm:$0xff]  ;;  %v4067_v29 = vcombine.low %v277_v18, %v281_v19 }
  0xbc   :  { %1749 = vmatpush1.bf16.msra.mxu0 %v4025_v47  ;;  %1831 = vmatpush1.bf16.msra.mxu1 %v4027_v48  ;;  %v4066_v22 = vcombine.high %v276_v16, %v280_v17  ;;  %v284_v24 = vld [vmem:[#allocation4 + $0x280] sm:$0xff]  ;;  %v289_v27 = vld [vmem:[#allocation4 + $0x2a8] sm:$0xff]  ;;  %v4065_v28 = vcombine.low %v276_v16, %v280_v17 }
  0xbd   :  { %1750 = vmatprep.subr.bf16.mxu0 %v4034_v49  ;;  %1832 = vmatprep.subr.bf16.mxu1 %v4036_v50  ;;  %v288_v25 = vld [vmem:[#allocation4 + $0x2a0] sm:$0xff]  ;;  %v4076_v31 = vcombine.high %v285_v26, %v289_v27  ;;  %v293_v34 = vld [vmem:[#allocation4 + $0x2c8] sm:$0xff]  ;;  %v4075_v37 = vcombine.low %v285_v26, %v289_v27 }
  0xbe   :  { %1772 = vmatprep.mubr.bf16.mxu0 %v5371_v9  ;;  %1854 = vmatprep.mubr.bf16.mxu1 %v5371_v9  ;;  %v4074_v30 = vcombine.high %v284_v24, %v288_v25  ;;  %v292_v32 = vld [vmem:[#allocation4 + $0x2c0] sm:$0xff]  ;;  %v297_v35 = vld [vmem:[#allocation4 + $0x2e8] sm:$0xff]  ;;  %v4073_v36 = vcombine.low %v284_v24, %v288_v25  ;;  %v5384_v25 = vpack.c.bf16 %v5367_v63, %v5367_v63 }
  0xbf   :  { %v296_v33 = vld [vmem:[#allocation4 + $0x2e0] sm:$0xff]  ;;  %v4084_v39 = vcombine.high %v293_v34, %v297_v35  ;;  %v301_v42 = vld [vmem:[#allocation4 + $0x308] sm:$0xff]  ;;  %v4083_v46 = vcombine.low %v293_v34, %v297_v35 }
  0xc0   :  { %1751 = vmatpush1.bf16.msra.mxu0 %v4033_v56  ;;  %1833 = vmatpush1.bf16.msra.mxu1 %v4035_v57  ;;  %v4082_v38 = vcombine.high %v292_v32, %v296_v33  ;;  %v300_v40 = vld [vmem:[#allocation4 + $0x300] sm:$0xff]  ;;  %v305_v43 = vld [vmem:[#allocation4 + $0x328] sm:$0xff]  ;;  %v4081_v45 = vcombine.low %v292_v32, %v296_v33 }
  0xc1   :  { %1752 = vmatprep.subr.bf16.mxu0 %v4042_v58  ;;  %1834 = vmatprep.subr.bf16.mxu1 %v4044_v60  ;;  %v304_v41 = vld [vmem:[#allocation4 + $0x320] sm:$0xff]  ;;  %v4092_v48 = vcombine.high %v301_v42, %v305_v43  ;;  %v309_v51 = vld [vmem:[#allocation4 + $0x348] sm:$0xff]  ;;  %v4091_v55 = vcombine.low %v301_v42, %v305_v43 }
  0xc2   :  { %v4090_v47 = vcombine.high %v300_v40, %v304_v41  ;;  %v308_v49 = vld [vmem:[#allocation4 + $0x340] sm:$0xff]  ;;  %v313_v52 = vld [vmem:[#allocation4 + $0x368] sm:$0xff]  ;;  %v4089_v54 = vcombine.low %v300_v40, %v304_v41 }
  0xc3   :  { %v312_v50 = vld [vmem:[#allocation4 + $0x360] sm:$0xff]  ;;  %v4100_v57 = vcombine.high %v309_v51, %v313_v52  ;;  %v317_v61 = vld [vmem:[#allocation4 + $0x388] sm:$0xff]  ;;  %v4099_v1 = vcombine.low %v309_v51, %v313_v52 }
  0xc4   :  { %1753 = vmatpush1.bf16.msra.mxu0 %v4041_v2  ;;  %1835 = vmatpush1.bf16.msra.mxu1 %v4043_v4  ;;  %v4098_v56 = vcombine.high %v308_v49, %v312_v50  ;;  %v316_v58 = vld [vmem:[#allocation4 + $0x380] sm:$0xff]  ;;  %v321_v62 = vld [vmem:[#allocation4 + $0x3a8] sm:$0xff]  ;;  %v4097_v0 = vcombine.low %v308_v49, %v312_v50 }
  0xc5   :  { %1754 = vmatprep.subr.bf16.mxu0 %v4050_v5  ;;  %1836 = vmatprep.subr.bf16.mxu1 %v4052_v6  ;;  %v320_v60 = vld [vmem:[#allocation4 + $0x3a0] sm:$0xff]  ;;  %v4108_v3 = vcombine.high %v317_v61, %v321_v62  ;;  %v179_v6 = vcombine.high %v5363_v59, %v5363_v59  ;;  %v325_v7 = vld [vmem:[#allocation4 + $0x3c8] sm:$0xff]  ;;  %v4107_v11 = vcombine.low %v317_v61, %v321_v62 }
  0xc6   :  { %v4106_v2 = vcombine.high %v316_v58, %v320_v60  ;;  %v324_v4 = vld [vmem:[#allocation4 + $0x3c0] sm:$0xff]  ;;  %v329_v8 = vld [vmem:[#allocation4 + $0x3e8] sm:$0xff]  ;;  %v4105_v10 = vcombine.low %v316_v58, %v320_v60 }
  0xc7   :  { %v328_v5 = vld [vmem:[#allocation4 + $0x3e0] sm:$0xff]  ;;  %v5378_v16 = vrot.slane %v179_v6, %v5358_v53  ;;  %v333_v17 = vld [vmem:[#allocation4 + $0x408] sm:$0xff]  ;;  %v4115_v59 = vcombine.low %v325_v7, %v329_v8 }
  0xc8   :  { %1755 = vmatpush1.bf16.msra.mxu0 %v4049_v12  ;;  %1837 = vmatpush1.bf16.msra.mxu1 %v4051_v13  ;;  %v4114_v12 = vcombine.high %v324_v4, %v328_v5  ;;  %v4116_v13 = vcombine.high %v325_v7, %v329_v8  ;;  %v337_v18 = vld [vmem:[#allocation4 + $0x428] sm:$0xff]  ;;  %v4113_v19 = vcombine.low %v324_v4, %v328_v5 }
  0xc9   :  { %1756 = vmatprep.subr.bf16.mxu0 %v4058_v14  ;;  %1838 = vmatprep.subr.bf16.mxu1 %v4060_v15  ;;  %v332_v14 = vld [vmem:[#allocation4 + $0x400] sm:$0xff]  ;;  %v195_v24 = vcombine.high %v5378_v16, %v5378_v16  ;;  %v341_v53 = vld [vmem:[#allocation4 + $0x448] sm:$0xff] }
  0xca   :  { %v336_v15 = vld [vmem:[#allocation4 + $0x420] sm:$0xff]  ;;  %v345_v26 = vld [vmem:[#allocation4 + $0x468] sm:$0xff] }
  0xcb   :  { %v4121_v27 = vcombine.low %v332_v14, %v336_v15  ;;  %v349_v32 = vld [vmem:[#allocation4 + $0x488] sm:$0xff]  ;;  %v4132_v33 = vcombine.high %v341_v53, %v345_v26  ;;  %v5386_v35 = vpack.c.bf16 %v195_v24, %v195_v24 }
  0xcc   :  { %1757 = vmatpush1.bf16.msra.mxu0 %v4057_v20  ;;  %1839 = vmatpush1.bf16.msra.mxu1 %v4059_v21  ;;  %v4122_v20 = vcombine.high %v332_v14, %v336_v15  ;;  %v4124_v21 = vcombine.high %v333_v17, %v337_v18  ;;  %v353_v34 = vld [vmem:[#allocation4 + $0x4a8] sm:$0xff] }
  0xcd   :  { %1758 = vmatprep.subr.bf16.mxu0 %v4066_v22  ;;  %1840 = vmatprep.subr.bf16.mxu1 %v4068_v23  ;;  %v340_v22 = vld [vmem:[#allocation4 + $0x440] sm:$0xff]  ;;  %v357_v40 = vld [vmem:[#allocation4 + $0x4c8] sm:$0xff]  ;;  %v4140_v41 = vcombine.high %v349_v32, %v353_v34 }
  0xce   :  { %v344_v23 = vld [vmem:[#allocation4 + $0x460] sm:$0xff]  ;;  %v361_v42 = vld [vmem:[#allocation4 + $0x4e8] sm:$0xff] }
  0xcf   :  { %v4129_v63 = vcombine.low %v340_v22, %v344_v23  ;;  %v365_v49 = vld [vmem:[#allocation4 + $0x508] sm:$0xff]  ;;  %v4148_v50 = vcombine.high %v357_v40, %v361_v42 }
  0xd0   :  { %1759 = vmatpush1.bf16.msra.mxu0 %v4065_v28  ;;  %1841 = vmatpush1.bf16.msra.mxu1 %v4067_v29  ;;  %v4123_v28 = vcombine.low %v333_v17, %v337_v18  ;;  %v4130_v29 = vcombine.high %v340_v22, %v344_v23  ;;  %v369_v51 = vld [vmem:[#allocation4 + $0x528] sm:$0xff] }
  0xd1   :  { %1760 = vmatprep.subr.bf16.mxu0 %v4074_v30  ;;  %1842 = vmatprep.subr.bf16.mxu1 %v4076_v31  ;;  %v348_v30 = vld [vmem:[#allocation4 + $0x480] sm:$0xff]  ;;  %v373_v58 = vld [vmem:[#allocation4 + $0x548] sm:$0xff]  ;;  %v4156_v60 = vcombine.high %v365_v49, %v369_v51 }
  0xd2   :  { %v352_v31 = vld [vmem:[#allocation4 + $0x4a0] sm:$0xff]  ;;  %v377_v61 = vld [vmem:[#allocation4 + $0x568] sm:$0xff] }
  0xd3   :  { %v4137_v43 = vcombine.low %v348_v30, %v352_v31  ;;  %v381_v4 = vld [vmem:[#allocation4 + $0x588] sm:$0xff]  ;;  %v4164_v5 = vcombine.high %v373_v58, %v377_v61  ;;  %v4163_v8 = vcombine.low %v373_v58, %v377_v61 }
  0xd4   :  { %1761 = vmatpush1.bf16.msra.mxu0 %v4073_v36  ;;  %1843 = vmatpush1.bf16.msra.mxu1 %v4075_v37  ;;  %v4131_v36 = vcombine.low %v341_v53, %v345_v26  ;;  %v4138_v37 = vcombine.high %v348_v30, %v352_v31  ;;  %v385_v6 = vld [vmem:[#allocation4 + $0x5a8] sm:$0xff] }
  0xd5   :  { %1762 = vmatprep.subr.bf16.mxu0 %v4082_v38  ;;  %1844 = vmatprep.subr.bf16.mxu1 %v4084_v39  ;;  %v356_v38 = vld [vmem:[#allocation4 + $0x4c0] sm:$0xff]  ;;  %v4172_v14 = vcombine.high %v381_v4, %v385_v6  ;;  %v393_v15 = vld [vmem:[#allocation4 + $0x5e8] sm:$0xff]  ;;  %v4171_v18 = vcombine.low %v381_v4, %v385_v6 }
  0xd6   :  { %v360_v39 = vld [vmem:[#allocation4 + $0x4e0] sm:$0xff]  ;;  %v401_v23 = vld [vmem:[#allocation4 + $0x628] sm:$0xff] }
  0xd7   :  { %v4145_v52 = vcombine.low %v356_v38, %v360_v39  ;;  %v409_v31 = vld [vmem:[#allocation4 + $0x668] sm:$0xff] }
  0xd8   :  { %1763 = vmatpush1.bf16.msra.mxu0 %v4081_v45  ;;  %1845 = vmatpush1.bf16.msra.mxu1 %v4083_v46  ;;  %v4139_v45 = vcombine.low %v349_v32, %v353_v34  ;;  %v4146_v46 = vcombine.high %v356_v38, %v360_v39  ;;  %v417_v39 = vld [vmem:[#allocation4 + $0x6a8] sm:$0xff] }
  0xd9   :  { %1764 = vmatprep.subr.bf16.mxu0 %v4090_v47  ;;  %1846 = vmatprep.subr.bf16.mxu1 %v4092_v48  ;;  %v364_v47 = vld [vmem:[#allocation4 + $0x500] sm:$0xff] }
  0xda   :  { %v368_v48 = vld [vmem:[#allocation4 + $0x520] sm:$0xff] }
  0xdb   :  { %v4153_v62 = vcombine.low %v364_v47, %v368_v48 }
  0xdc   :  { %1765 = vmatpush1.bf16.msra.mxu0 %v4089_v54  ;;  %1847 = vmatpush1.bf16.msra.mxu1 %v4091_v55  ;;  %v4147_v54 = vcombine.low %v357_v40, %v361_v42  ;;  %v4154_v55 = vcombine.high %v364_v47, %v368_v48  ;;  %v425_v48 = vld [vmem:[#allocation4 + $0x6e8] sm:$0xff] }
  0xdd   :  { %1766 = vmatprep.subr.bf16.mxu0 %v4098_v56  ;;  %1848 = vmatprep.subr.bf16.mxu1 %v4100_v57  ;;  %v372_v56 = vld [vmem:[#allocation4 + $0x540] sm:$0xff] }
  0xde   :  { %v376_v57 = vld [vmem:[#allocation4 + $0x560] sm:$0xff] }
  0xdf   :  { %v4161_v7 = vcombine.low %v372_v56, %v376_v57 }
  0xe0   :  { %1767 = vmatpush1.bf16.msra.mxu0 %v4097_v0  ;;  %1849 = vmatpush1.bf16.msra.mxu1 %v4099_v1  ;;  %v4155_v0 = vcombine.low %v365_v49, %v369_v51  ;;  %v4162_v1 = vcombine.high %v372_v56, %v376_v57  ;;  %v433_v57 = vld [vmem:[#allocation4 + $0x728] sm:$0xff] }
  0xe1   :  { %1768 = vmatprep.subr.bf16.mxu0 %v4106_v2  ;;  %1850 = vmatprep.subr.bf16.mxu1 %v4108_v3  ;;  %v380_v2 = vld [vmem:[#allocation4 + $0x580] sm:$0xff] }
  0xe2   :  { %v384_v3 = vld [vmem:[#allocation4 + $0x5a0] sm:$0xff] }
  0xe3   :  { %v4169_v17 = vcombine.low %v380_v2, %v384_v3 }
  0xe4   :  { %1769 = vmatpush1.bf16.msra.mxu0 %v4105_v10  ;;  %1851 = vmatpush1.bf16.msra.mxu1 %v4107_v11  ;;  %v4170_v10 = vcombine.high %v380_v2, %v384_v3  ;;  %v388_v11 = vld [vmem:[#allocation4 + $0x5c0] sm:$0xff]  ;;  %v441_v3 = vld [vmem:[#allocation4 + $0x768] sm:$0xff] }
  0xe5   :  { %1770 = vmatprep.subr.bf16.mxu0 %v4114_v12  ;;  %1852 = vmatprep.subr.bf16.mxu1 %v4116_v13  ;;  %v392_v12 = vld [vmem:[#allocation4 + $0x5e0] sm:$0xff]  ;;  %v389_v13 = vld [vmem:[#allocation4 + $0x5c8] sm:$0xff] }
  0xe6   :  { %v4180_v22 = vcombine.high %v389_v13, %v393_v15  ;;  %v4177_v24 = vcombine.low %v388_v11, %v392_v12  ;;  %v4179_v53 = vcombine.low %v389_v13, %v393_v15 }
  0xe8   :  { %1771 = vmatpush1.bf16.msra.mxu0 %v4113_v19  ;;  %1853 = vmatpush1.bf16.msra.mxu1 %v4115_v59  ;;  %v4178_v19 = vcombine.high %v388_v11, %v392_v12  ;;  %v396_v59 = vld [vmem:[#allocation4 + $0x600] sm:$0xff]  ;;  %v449_v12 = vld [vmem:[#allocation4 + $0x7a8] sm:$0xff] }
  0xe9   :  { %1781 = vmatprep.subr.bf16.mxu0 %v4122_v20  ;;  %1863 = vmatprep.subr.bf16.mxu1 %v4124_v21  ;;  %v400_v20 = vld [vmem:[#allocation4 + $0x620] sm:$0xff]  ;;  %v397_v21 = vld [vmem:[#allocation4 + $0x608] sm:$0xff] }
  0xea   :  { %v4186_v26 = vcombine.high %v396_v59, %v400_v20  ;;  %v4188_v30 = vcombine.high %v397_v21, %v401_v23  ;;  %v4185_v32 = vcombine.low %v396_v59, %v400_v20  ;;  %v457_v20 = vld [vmem:[#allocation4 + $0x7e8] sm:$0xff] }
  0xeb   :  { %1773 = vmatmul.mubr.bf16.vlgmr.msra.gmra.mrb[0].mxu0 %v5384_v25  ;;  %1855 = vmatmul.mubr.bf16.vlgmr.msra.gmra.mrb[0].mxu1 %v5384_v25 }
  0xec   :  { %1782 = vmatpush1.bf16.msra.mxu0 %v4121_v27  ;;  %1864 = vmatpush1.bf16.msra.mxu1 %v4123_v28  ;;  %v404_v27 = vld [vmem:[#allocation4 + $0x640] sm:$0xff] }
  0xed   :  { %1783 = vmatprep.subr.bf16.mxu0 %v4130_v29  ;;  %1865 = vmatprep.subr.bf16.mxu1 %v4132_v33  ;;  %v408_v28 = vld [vmem:[#allocation4 + $0x660] sm:$0xff]  ;;  %v405_v29 = vld [vmem:[#allocation4 + $0x648] sm:$0xff]  ;;  %v4187_v33 = vcombine.low %v397_v21, %v401_v23 }
  0xee   :  { %1813 = vmatprep.mubr.bf16.mxu0 %v5386_v35  ;;  %1895 = vmatprep.mubr.bf16.mxu1 %v5386_v35  ;;  %v4194_v34 = vcombine.high %v404_v27, %v408_v28  ;;  %v4196_v38 = vcombine.high %v405_v29, %v409_v31  ;;  %v4193_v40 = vcombine.low %v404_v27, %v408_v28  ;;  %v211_v28 = vld [vmem:[#allocation4 + $0x38] sm:$0xff] }
  0xf0   :  { %1784 = vmatpush1.bf16.msra.mxu0 %v4129_v63  ;;  %1866 = vmatpush1.bf16.msra.mxu1 %v4131_v36  ;;  %v412_v63 = vld [vmem:[#allocation4 + $0x680] sm:$0xff] }
  0xf1   :  { %1785 = vmatprep.subr.bf16.mxu0 %v4138_v37  ;;  %1867 = vmatprep.subr.bf16.mxu1 %v4140_v41  ;;  %v416_v36 = vld [vmem:[#allocation4 + $0x6a0] sm:$0xff]  ;;  %v413_v37 = vld [vmem:[#allocation4 + $0x688] sm:$0xff]  ;;  %v4195_v41 = vcombine.low %v405_v29, %v409_v31 }
  0xf2   :  { %v4202_v42 = vcombine.high %v412_v63, %v416_v36  ;;  %v4204_v47 = vcombine.high %v413_v37, %v417_v39  ;;  %v4201_v49 = vcombine.low %v412_v63, %v416_v36  ;;  %v219_v36 = vld [vmem:[#allocation4 + $0x78] sm:$0xff] }
  0xf4   :  { %1786 = vmatpush1.bf16.msra.mxu0 %v4137_v43  ;;  %1868 = vmatpush1.bf16.msra.mxu1 %v4139_v45  ;;  %v420_v43 = vld [vmem:[#allocation4 + $0x6c0] sm:$0xff] }
  0xf5   :  { %1787 = vmatprep.subr.bf16.mxu0 %v4146_v46  ;;  %1869 = vmatprep.subr.bf16.mxu1 %v4148_v50  ;;  %v424_v45 = vld [vmem:[#allocation4 + $0x6e0] sm:$0xff]  ;;  %v421_v46 = vld [vmem:[#allocation4 + $0x6c8] sm:$0xff]  ;;  %v4203_v50 = vcombine.low %v413_v37, %v417_v39  ;;  %v5394_v37 = vpack.c.bf16 %v5378_v16, %v5378_v16  ;;  %v222_v39 = vld [vmem:[#allocation4 + $0x90] sm:$0xff] }
  0xf6   :  { %v4210_v51 = vcombine.high %v420_v43, %v424_v45  ;;  %v4212_v56 = vcombine.high %v421_v46, %v425_v48  ;;  %v4209_v58 = vcombine.low %v420_v43, %v424_v45  ;;  %v223_v43 = vld [vmem:[#allocation4 + $0x98] sm:$0xff]  ;;  %v230_v16 = vld [vmem:[#allocation4 + $0xd0] sm:$0xff] }
  0xf7   :  { %v227_v45 = vld [vmem:[#allocation4 + $0xb8] sm:$0xff] }
  0xf8   :  { %1788 = vmatpush1.bf16.msra.mxu0 %v4145_v52  ;;  %1870 = vmatpush1.bf16.msra.mxu1 %v4147_v54  ;;  %v428_v52 = vld [vmem:[#allocation4 + $0x700] sm:$0xff] }
  0xf9   :  { %1789 = vmatprep.subr.bf16.mxu0 %v4154_v55  ;;  %1871 = vmatprep.subr.bf16.mxu1 %v4156_v60  ;;  %v432_v54 = vld [vmem:[#allocation4 + $0x720] sm:$0xff]  ;;  %v429_v55 = vld [vmem:[#allocation4 + $0x708] sm:$0xff]  ;;  %v4211_v60 = vcombine.low %v421_v46, %v425_v48 }
  0xfa   :  { %v4218_v61 = vcombine.high %v428_v52, %v432_v54  ;;  %v4220_v2 = vcombine.high %v429_v55, %v433_v57  ;;  %v4217_v4 = vcombine.low %v428_v52, %v432_v54  ;;  %v235_v52 = vld [vmem:[#allocation4 + $0xf8] sm:$0xff]  ;;  %v4016_v54 = vcombine.high %v223_v43, %v227_v45 }
  0xfc   :  { %1790 = vmatpush1.bf16.msra.mxu0 %v4153_v62  ;;  %1872 = vmatpush1.bf16.msra.mxu1 %v4155_v0  ;;  %v436_v62 = vld [vmem:[#allocation4 + $0x740] sm:$0xff] }
  0xfd   :  { %1791 = vmatprep.subr.bf16.mxu0 %v4162_v1  ;;  %1873 = vmatprep.subr.bf16.mxu1 %v4164_v5  ;;  %v440_v0 = vld [vmem:[#allocation4 + $0x760] sm:$0xff]  ;;  %v437_v1 = vld [vmem:[#allocation4 + $0x748] sm:$0xff]  ;;  %v4219_v5 = vcombine.low %v429_v55, %v433_v57  ;;  %v242_v57 = vld [vmem:[#allocation4 + $0x130] sm:$0xff] }
  0xfe   :  { %v4226_v6 = vcombine.high %v436_v62, %v440_v0  ;;  %v4228_v11 = vcombine.high %v437_v1, %v441_v3  ;;  %v4225_v13 = vcombine.low %v436_v62, %v440_v0  ;;  %v243_v62 = vld [vmem:[#allocation4 + $0x138] sm:$0xff] }
 0x100   :  { %1792 = vmatpush1.bf16.msra.mxu0 %v4161_v7  ;;  %1874 = vmatpush1.bf16.msra.mxu1 %v4163_v8  ;;  %v444_v7 = vld [vmem:[#allocation4 + $0x780] sm:$0xff] }
 0x101   :  { %1793 = vmatprep.subr.bf16.mxu0 %v4170_v10  ;;  %1875 = vmatprep.subr.bf16.mxu1 %v4172_v14  ;;  %v448_v8 = vld [vmem:[#allocation4 + $0x7a0] sm:$0xff]  ;;  %v445_v10 = vld [vmem:[#allocation4 + $0x788] sm:$0xff]  ;;  %v4227_v14 = vcombine.low %v437_v1, %v441_v3  ;;  %v250_v3 = vld [vmem:[#allocation4 + $0x170] sm:$0xff] }
 0x102   :  { %v4234_v15 = vcombine.high %v444_v7, %v448_v8  ;;  %v4236_v59 = vcombine.high %v445_v10, %v449_v12  ;;  %v4233_v21 = vcombine.low %v444_v7, %v448_v8 }
 0x104   :  { %1794 = vmatpush1.bf16.msra.mxu0 %v4169_v17  ;;  %1876 = vmatpush1.bf16.msra.mxu1 %v4171_v18  ;;  %v452_v17 = vld [vmem:[#allocation4 + $0x7c0] sm:$0xff] }
 0x105   :  { %1795 = vmatprep.subr.bf16.mxu0 %v4178_v19  ;;  %1877 = vmatprep.subr.bf16.mxu1 %v4180_v22  ;;  %v456_v18 = vld [vmem:[#allocation4 + $0x7e0] sm:$0xff]  ;;  %v453_v19 = vld [vmem:[#allocation4 + $0x7c8] sm:$0xff]  ;;  %v4235_v22 = vcombine.low %v445_v10, %v449_v12  ;;  %v254_v10 = vld [vmem:[#allocation4 + $0x190] sm:$0xff] }
 0x106   :  { %v4242_v23 = vcombine.high %v452_v17, %v456_v18  ;;  %v4244_v27 = vcombine.high %v453_v19, %v457_v20  ;;  %v4241_v29 = vcombine.low %v452_v17, %v456_v18 }
 0x108   :  { %1796 = vmatpush1.bf16.msra.mxu0 %v4177_v24  ;;  %1878 = vmatpush1.bf16.msra.mxu1 %v4179_v53  ;;  %v206_v24 = vld [vmem:[#allocation4 + $0x10] sm:$0xff] }
 0x109   :  { %1797 = vmatprep.subr.bf16.mxu0 %v4186_v26  ;;  %1879 = vmatprep.subr.bf16.mxu1 %v4188_v30  ;;  %v210_v53 = vld [vmem:[#allocation4 + $0x30] sm:$0xff]  ;;  %v207_v26 = vld [vmem:[#allocation4 + $0x18] sm:$0xff]  ;;  %v4243_v30 = vcombine.low %v453_v19, %v457_v20 }
 0x10a   :  { %v3998_v31 = vcombine.high %v206_v24, %v210_v53  ;;  %v4000_v63 = vcombine.high %v207_v26, %v211_v28  ;;  %v262_v19 = vld [vmem:[#allocation4 + $0x1d0] sm:$0xff] }
 0x10c   :  { %1798 = vmatpush1.bf16.msra.mxu0 %v4185_v32  ;;  %1880 = vmatpush1.bf16.msra.mxu1 %v4187_v33  ;;  %v214_v32 = vld [vmem:[#allocation4 + $0x50] sm:$0xff] }
 0x10d   :  { %1799 = vmatprep.subr.bf16.mxu0 %v4194_v34  ;;  %1881 = vmatprep.subr.bf16.mxu1 %v4196_v38  ;;  %v218_v33 = vld [vmem:[#allocation4 + $0x70] sm:$0xff]  ;;  %v215_v34 = vld [vmem:[#allocation4 + $0x58] sm:$0xff]  ;;  %v3997_v38 = vcombine.low %v206_v24, %v210_v53 }
 0x10e   :  { %v4008_v46 = vcombine.high %v215_v34, %v219_v36  ;;  %v4007_v48 = vcombine.low %v215_v34, %v219_v36  ;;  %v278_v34 = vld [vmem:[#allocation4 + $0x250] sm:$0xff] }
 0x110   :  { %1800 = vmatpush1.bf16.msra.mxu0 %v4193_v40  ;;  %1882 = vmatpush1.bf16.msra.mxu1 %v4195_v41  ;;  %v226_v40 = vld [vmem:[#allocation4 + $0xb0] sm:$0xff]  ;;  %v3999_v41 = vcombine.low %v207_v26, %v211_v28 }
 0x111   :  { %1801 = vmatprep.subr.bf16.mxu0 %v4202_v42  ;;  %1883 = vmatprep.subr.bf16.mxu1 %v4204_v47  ;;  %v4006_v42 = vcombine.high %v214_v32, %v218_v33  ;;  %v4005_v47 = vcombine.low %v214_v32, %v218_v33  ;;  %v4013_v55 = vcombine.low %v222_v39, %v226_v40  ;;  %v270_v26 = vld [vmem:[#allocation4 + $0x210] sm:$0xff] }
 0x114   :  { %1802 = vmatpush1.bf16.msra.mxu0 %v4201_v49  ;;  %1884 = vmatpush1.bf16.msra.mxu1 %v4203_v50  ;;  %v4014_v49 = vcombine.high %v222_v39, %v226_v40  ;;  %v234_v50 = vld [vmem:[#allocation4 + $0xf0] sm:$0xff]  ;;  %v279_v39 = vld [vmem:[#allocation4 + $0x258] sm:$0xff] }
 0x115   :  { %1803 = vmatprep.subr.bf16.mxu0 %v4210_v51  ;;  %1885 = vmatprep.subr.bf16.mxu1 %v4212_v56  ;;  %v231_v51 = vld [vmem:[#allocation4 + $0xd8] sm:$0xff]  ;;  %v238_v56 = vld [vmem:[#allocation4 + $0x110] sm:$0xff]  ;;  %v4021_v1 = vcombine.low %v230_v16, %v234_v50 }
 0x116   :  { %v4024_v0 = vcombine.high %v231_v51, %v235_v52  ;;  %v4029_v8 = vcombine.low %v238_v56, %v242_v57  ;;  %v283_v40 = vld [vmem:[#allocation4 + $0x278] sm:$0xff] }
 0x118   :  { %1804 = vmatpush1.bf16.msra.mxu0 %v4209_v58  ;;  %1886 = vmatpush1.bf16.msra.mxu1 %v4211_v60  ;;  %v4015_v58 = vcombine.low %v223_v43, %v227_v45  ;;  %v4022_v60 = vcombine.high %v230_v16, %v234_v50  ;;  %v286_v43 = vld [vmem:[#allocation4 + $0x290] sm:$0xff]  ;;  %v287_v16 = vld [vmem:[#allocation4 + $0x298] sm:$0xff] }
 0x119   :  { %1805 = vmatprep.subr.bf16.mxu0 %v4218_v61  ;;  %1887 = vmatprep.subr.bf16.mxu1 %v4220_v2  ;;  %v239_v61 = vld [vmem:[#allocation4 + $0x118] sm:$0xff]  ;;  %v246_v2 = vld [vmem:[#allocation4 + $0x150] sm:$0xff] }
 0x11a   :  { %v4032_v7 = vcombine.high %v239_v61, %v243_v62  ;;  %v4031_v12 = vcombine.low %v239_v61, %v243_v62  ;;  %v4037_v18 = vcombine.low %v246_v2, %v250_v3  ;;  %v290_v45 = vld [vmem:[#allocation4 + $0x2b0] sm:$0xff] }
 0x11b   :  { %v302_v61 = vld [vmem:[#allocation4 + $0x310] sm:$0xff] }
 0x11c   :  { %1806 = vmatpush1.bf16.msra.mxu0 %v4217_v4  ;;  %1888 = vmatpush1.bf16.msra.mxu1 %v4219_v5  ;;  %v4023_v4 = vcombine.low %v231_v51, %v235_v52  ;;  %v247_v5 = vld [vmem:[#allocation4 + $0x158] sm:$0xff]  ;;  %v294_v51 = vld [vmem:[#allocation4 + $0x2d0] sm:$0xff] }
 0x11d   :  { %1807 = vmatprep.subr.bf16.mxu0 %v4226_v6  ;;  %1889 = vmatprep.subr.bf16.mxu1 %v4228_v11  ;;  %v251_v6 = vld [vmem:[#allocation4 + $0x178] sm:$0xff]  ;;  %v258_v11 = vld [vmem:[#allocation4 + $0x1b0] sm:$0xff] }
 0x11e   :  { %v4040_v17 = vcombine.high %v247_v5, %v251_v6  ;;  %v4039_v20 = vcombine.low %v247_v5, %v251_v6  ;;  %v4045_v53 = vcombine.low %v254_v10, %v258_v11  ;;  %v298_v52 = vld [vmem:[#allocation4 + $0x2f0] sm:$0xff] }
 0x11f   :  { %v306_v62 = vld [vmem:[#allocation4 + $0x330] sm:$0xff] }
 0x120   :  { %1808 = vmatpush1.bf16.msra.mxu0 %v4225_v13  ;;  %1890 = vmatpush1.bf16.msra.mxu1 %v4227_v14  ;;  %v4038_v13 = vcombine.high %v246_v2, %v250_v3  ;;  %v255_v14 = vld [vmem:[#allocation4 + $0x198] sm:$0xff]  ;;  %v310_v5 = vld [vmem:[#allocation4 + $0x350] sm:$0xff] }
 0x121   :  { %1809 = vmatprep.subr.bf16.mxu0 %v4234_v15  ;;  %1891 = vmatprep.subr.bf16.mxu1 %v4236_v59  ;;  %v259_v15 = vld [vmem:[#allocation4 + $0x1b8] sm:$0xff]  ;;  %v266_v59 = vld [vmem:[#allocation4 + $0x1f0] sm:$0xff] }
 0x122   :  { %v4048_v24 = vcombine.high %v255_v14, %v259_v15  ;;  %v4047_v28 = vcombine.low %v255_v14, %v259_v15  ;;  %v4053_v33 = vcombine.low %v262_v19, %v266_v59  ;;  %v303_v2 = vld [vmem:[#allocation4 + $0x318] sm:$0xff]  ;;  %v314_v6 = vld [vmem:[#allocation4 + $0x370] sm:$0xff] }
 0x123   :  { %v307_v3 = vld [vmem:[#allocation4 + $0x338] sm:$0xff]  ;;  %v318_v14 = vld [vmem:[#allocation4 + $0x390] sm:$0xff] }
 0x124   :  { %1810 = vmatpush1.bf16.msra.mxu0 %v4233_v21  ;;  %1892 = vmatpush1.bf16.msra.mxu1 %v4235_v22  ;;  %v4046_v21 = vcombine.high %v254_v10, %v258_v11  ;;  %v263_v22 = vld [vmem:[#allocation4 + $0x1d8] sm:$0xff]  ;;  %v322_v15 = vld [vmem:[#allocation4 + $0x3b0] sm:$0xff] }
 0x125   :  { %1811 = vmatprep.subr.bf16.mxu0 %v4242_v23  ;;  %1893 = vmatprep.subr.bf16.mxu1 %v4244_v27  ;;  %v267_v23 = vld [vmem:[#allocation4 + $0x1f8] sm:$0xff]  ;;  %v274_v27 = vld [vmem:[#allocation4 + $0x230] sm:$0xff] }
 0x126   :  { %v4056_v32 = vcombine.high %v263_v22, %v267_v23  ;;  %v4055_v36 = vcombine.low %v263_v22, %v267_v23  ;;  %v311_v10 = vld [vmem:[#allocation4 + $0x358] sm:$0xff]  ;;  %v326_v22 = vld [vmem:[#allocation4 + $0x3d0] sm:$0xff] }
 0x127   :  { %v315_v11 = vld [vmem:[#allocation4 + $0x378] sm:$0xff]  ;;  %v330_v23 = vld [vmem:[#allocation4 + $0x3f0] sm:$0xff] }
 0x128   :  { %1812 = vmatpush1.bf16.msra.mxu0 %v4241_v29  ;;  %1894 = vmatpush1.bf16.msra.mxu1 %v4243_v30  ;;  %v4054_v29 = vcombine.high %v262_v19, %v266_v59  ;;  %v271_v30 = vld [vmem:[#allocation4 + $0x218] sm:$0xff] }
 0x129   :  { %1904 = vmatprep.subr.bf16.mxu0 %v3998_v31  ;;  %1986 = vmatprep.subr.bf16.mxu1 %v4000_v63  ;;  %v275_v31 = vld [vmem:[#allocation4 + $0x238] sm:$0xff]  ;;  %v282_v63 = vld [vmem:[#allocation4 + $0x270] sm:$0xff] }
 0x12a   :  { %v4069_v50 = vcombine.low %v278_v34, %v282_v63  ;;  %v319_v19 = vld [vmem:[#allocation4 + $0x398] sm:$0xff] }
 0x12b   :  { %1814 = vmatmul.mubr.bf16.vlgmr.msra.gmra.mrb[0].mxu0 %v5394_v37  ;;  %1896 = vmatmul.mubr.bf16.vlgmr.msra.gmra.mrb[0].mxu1 %v5394_v37  ;;  %v323_v59 = vld [vmem:[#allocation4 + $0x3b8] sm:$0xff] }
 0x12c   :  { %1905 = vmatpush1.bf16.msra.mxu0 %v3997_v38  ;;  %1987 = vmatpush1.bf16.msra.mxu1 %v3999_v41  ;;  %v4062_v38 = vcombine.high %v270_v26, %v274_v27  ;;  %v4064_v41 = vcombine.high %v271_v30, %v275_v31 }
 0x12d   :  { %1906 = vmatprep.subr.bf16.mxu0 %v4006_v42  ;;  %1988 = vmatprep.subr.bf16.mxu1 %v4008_v46  ;;  %v4061_v42 = vcombine.low %v270_v26, %v274_v27  ;;  %v4063_v46 = vcombine.low %v271_v30, %v275_v31  ;;  %v327_v26 = vld [vmem:[#allocation4 + $0x3d8] sm:$0xff]  ;;  %v334_v30 = vld [vmem:[#allocation4 + $0x410] sm:$0xff] }
 0x12e   :  { %1936 = vmatprep.mubr.bf16.mxu0 %v5371_v9  ;;  %2018 = vmatprep.mubr.bf16.mxu1 %v5371_v9  ;;  %v4030_v9 = vcombine.high %v238_v56, %v242_v57  ;;  %v295_v56 = vld [vmem:[#allocation4 + $0x2d8] sm:$0xff]  ;;  %v338_v31 = vld [vmem:[#allocation4 + $0x430] sm:$0xff] }
 0x12f   :  { %v299_v57 = vld [vmem:[#allocation4 + $0x2f8] sm:$0xff] }
 0x130   :  { %1907 = vmatpush1.bf16.msra.mxu0 %v4005_v47  ;;  %1989 = vmatpush1.bf16.msra.mxu1 %v4007_v48  ;;  %v4070_v47 = vcombine.high %v278_v34, %v282_v63  ;;  %v291_v48 = vld [vmem:[#allocation4 + $0x2b8] sm:$0xff] }
 0x131   :  { %1908 = vmatprep.subr.bf16.mxu0 %v4014_v49  ;;  %1990 = vmatprep.subr.bf16.mxu1 %v4016_v54  ;;  %v4072_v49 = vcombine.high %v279_v39, %v283_v40  ;;  %v4071_v54 = vcombine.low %v279_v39, %v283_v40  ;;  %v331_v27 = vld [vmem:[#allocation4 + $0x3f8] sm:$0xff]  ;;  %v342_v39 = vld [vmem:[#allocation4 + $0x450] sm:$0xff] }
 0x132   :  { %v335_v34 = vld [vmem:[#allocation4 + $0x418] sm:$0xff]  ;;  %v346_v40 = vld [vmem:[#allocation4 + $0x470] sm:$0xff] }
 0x133   :  { %v339_v63 = vld [vmem:[#allocation4 + $0x438] sm:$0xff] }
 0x134   :  { %1909 = vmatpush1.bf16.msra.mxu0 %v4013_v55  ;;  %1991 = vmatpush1.bf16.msra.mxu1 %v4015_v58  ;;  %v4078_v55 = vcombine.high %v286_v43, %v290_v45  ;;  %v4080_v58 = vcombine.high %v287_v16, %v291_v48 }
 0x135   :  { %1910 = vmatprep.subr.bf16.mxu0 %v4022_v60  ;;  %1992 = vmatprep.subr.bf16.mxu1 %v4024_v0  ;;  %v4077_v60 = vcombine.low %v286_v43, %v290_v45  ;;  %v4079_v0 = vcombine.low %v287_v16, %v291_v48  ;;  %v343_v43 = vld [vmem:[#allocation4 + $0x458] sm:$0xff]  ;;  %v350_v16 = vld [vmem:[#allocation4 + $0x490] sm:$0xff] }
 0x136   :  { %v347_v45 = vld [vmem:[#allocation4 + $0x478] sm:$0xff]  ;;  %v354_v48 = vld [vmem:[#allocation4 + $0x4b0] sm:$0xff] }
 0x138   :  { %1911 = vmatpush1.bf16.msra.mxu0 %v4021_v1  ;;  %1993 = vmatpush1.bf16.msra.mxu1 %v4023_v4  ;;  %v4086_v1 = vcombine.high %v294_v51, %v298_v52  ;;  %v4088_v4 = vcombine.high %v295_v56, %v299_v57 }
 0x139   :  { %1912 = vmatprep.subr.bf16.mxu0 %v4030_v9  ;;  %1994 = vmatprep.subr.bf16.mxu1 %v4032_v7  ;;  %v4085_v9 = vcombine.low %v294_v51, %v298_v52  ;;  %v4087_v7 = vcombine.low %v295_v56, %v299_v57  ;;  %v351_v51 = vld [vmem:[#allocation4 + $0x498] sm:$0xff]  ;;  %v4135_v56 = vcombine.low %v343_v43, %v347_v45 }
 0x13a   :  { %v355_v52 = vld [vmem:[#allocation4 + $0x4b8] sm:$0xff]  ;;  %v4142_v57 = vcombine.high %v350_v16, %v354_v48 }
 0x13c   :  { %1913 = vmatpush1.bf16.msra.mxu0 %v4029_v8  ;;  %1995 = vmatpush1.bf16.msra.mxu1 %v4031_v12  ;;  %v4094_v8 = vcombine.high %v302_v61, %v306_v62  ;;  %v4096_v12 = vcombine.high %v303_v2, %v307_v3 }
 0x13d   :  { %1914 = vmatprep.subr.bf16.mxu0 %v4038_v13  ;;  %1996 = vmatprep.subr.bf16.mxu1 %v4040_v17  ;;  %v4093_v13 = vcombine.low %v302_v61, %v306_v62  ;;  %v4095_v17 = vcombine.low %v303_v2, %v307_v3  ;;  %v362_v61 = vld [vmem:[#allocation4 + $0x4f0] sm:$0xff]  ;;  %v359_v62 = vld [vmem:[#allocation4 + $0x4d8] sm:$0xff] }
 0x140   :  { %1915 = vmatpush1.bf16.msra.mxu0 %v4037_v18  ;;  %1997 = vmatpush1.bf16.msra.mxu1 %v4039_v20  ;;  %v4102_v18 = vcombine.high %v310_v5, %v314_v6  ;;  %v4104_v20 = vcombine.high %v311_v10, %v315_v11 }
 0x141   :  { %1916 = vmatprep.subr.bf16.mxu0 %v4046_v21  ;;  %1998 = vmatprep.subr.bf16.mxu1 %v4048_v24  ;;  %v4101_v21 = vcombine.low %v310_v5, %v314_v6  ;;  %v4103_v24 = vcombine.low %v311_v10, %v315_v11  ;;  %v367_v5 = vld [vmem:[#allocation4 + $0x518] sm:$0xff]  ;;  %v374_v11 = vld [vmem:[#allocation4 + $0x550] sm:$0xff] }
 0x142   :  { %v371_v6 = vld [vmem:[#allocation4 + $0x538] sm:$0xff] }
 0x144   :  { %1917 = vmatpush1.bf16.msra.mxu0 %v4045_v53  ;;  %1999 = vmatpush1.bf16.msra.mxu1 %v4047_v28  ;;  %v4110_v53 = vcombine.high %v318_v14, %v322_v15  ;;  %v4112_v28 = vcombine.high %v319_v19, %v323_v59 }
 0x145   :  { %1918 = vmatprep.subr.bf16.mxu0 %v4054_v29  ;;  %2000 = vmatprep.subr.bf16.mxu1 %v4056_v32  ;;  %v4109_v29 = vcombine.low %v318_v14, %v322_v15  ;;  %v4111_v32 = vcombine.low %v319_v19, %v323_v59  ;;  %v379_v14 = vld [vmem:[#allocation4 + $0x578] sm:$0xff]  ;;  %v382_v59 = vld [vmem:[#allocation4 + $0x590] sm:$0xff] }
 0x148   :  { %1919 = vmatpush1.bf16.msra.mxu0 %v4053_v33  ;;  %2001 = vmatpush1.bf16.msra.mxu1 %v4055_v36  ;;  %v4118_v33 = vcombine.high %v326_v22, %v330_v23  ;;  %v4120_v36 = vcombine.high %v327_v26, %v331_v27 }
 0x149   :  { %1920 = vmatprep.subr.bf16.mxu0 %v4062_v38  ;;  %2002 = vmatprep.subr.bf16.mxu1 %v4064_v41  ;;  %v4117_v38 = vcombine.low %v326_v22, %v330_v23  ;;  %v4119_v41 = vcombine.low %v327_v26, %v331_v27  ;;  %v387_v22 = vld [vmem:[#allocation4 + $0x5b8] sm:$0xff]  ;;  %v390_v27 = vld [vmem:[#allocation4 + $0x5d0] sm:$0xff] }
 0x14c   :  { %1921 = vmatpush1.bf16.msra.mxu0 %v4061_v42  ;;  %2003 = vmatpush1.bf16.msra.mxu1 %v4063_v46  ;;  %v4126_v42 = vcombine.high %v334_v30, %v338_v31  ;;  %v4128_v46 = vcombine.high %v335_v34, %v339_v63 }
 0x14d   :  { %1922 = vmatprep.subr.bf16.mxu0 %v4070_v47  ;;  %2004 = vmatprep.subr.bf16.mxu1 %v4072_v49  ;;  %v4125_v47 = vcombine.low %v334_v30, %v338_v31  ;;  %v4127_v49 = vcombine.low %v335_v34, %v339_v63  ;;  %v395_v30 = vld [vmem:[#allocation4 + $0x5f8] sm:$0xff]  ;;  %v398_v63 = vld [vmem:[#allocation4 + $0x610] sm:$0xff] }
 0x150   :  { %1923 = vmatpush1.bf16.msra.mxu0 %v4069_v50  ;;  %2005 = vmatpush1.bf16.msra.mxu1 %v4071_v54  ;;  %v4134_v50 = vcombine.high %v342_v39, %v346_v40  ;;  %v4136_v54 = vcombine.high %v343_v43, %v347_v45  ;;  %v406_v45 = vld [vmem:[#allocation4 + $0x650] sm:$0xff] }
 0x151   :  { %1924 = vmatprep.subr.bf16.mxu0 %v4078_v55  ;;  %2006 = vmatprep.subr.bf16.mxu1 %v4080_v58  ;;  %v4133_v55 = vcombine.low %v342_v39, %v346_v40  ;;  %v4144_v58 = vcombine.high %v351_v51, %v355_v52  ;;  %v403_v39 = vld [vmem:[#allocation4 + $0x638] sm:$0xff] }
 0x154   :  { %1925 = vmatpush1.bf16.msra.mxu0 %v4077_v60  ;;  %2007 = vmatpush1.bf16.msra.mxu1 %v4079_v0  ;;  %v358_v60 = vld [vmem:[#allocation4 + $0x4d0] sm:$0xff]  ;;  %v363_v0 = vld [vmem:[#allocation4 + $0x4f8] sm:$0xff] }
 0x155   :  { %1926 = vmatprep.subr.bf16.mxu0 %v4086_v1  ;;  %2008 = vmatprep.subr.bf16.mxu1 %v4088_v4  ;;  %v4141_v1 = vcombine.low %v350_v16, %v354_v48  ;;  %v4150_v2 = vcombine.high %v358_v60, %v362_v61  ;;  %v4152_v3 = vcombine.high %v359_v62, %v363_v0  ;;  %v366_v4 = vld [vmem:[#allocation4 + $0x510] sm:$0xff]  ;;  %v411_v16 = vld [vmem:[#allocation4 + $0x678] sm:$0xff] }
 0x158   :  { %1927 = vmatpush1.bf16.msra.mxu0 %v4085_v9  ;;  %2009 = vmatpush1.bf16.msra.mxu1 %v4087_v7  ;;  %v370_v9 = vld [vmem:[#allocation4 + $0x530] sm:$0xff]  ;;  %v4149_v7 = vcombine.low %v358_v60, %v362_v61 }
 0x159   :  { %1928 = vmatprep.subr.bf16.mxu0 %v4094_v8  ;;  %2010 = vmatprep.subr.bf16.mxu1 %v4096_v12  ;;  %v4151_v8 = vcombine.low %v359_v62, %v363_v0  ;;  %v4158_v10 = vcombine.high %v366_v4, %v370_v9  ;;  %v378_v12 = vld [vmem:[#allocation4 + $0x570] sm:$0xff]  ;;  %v4157_v15 = vcombine.low %v366_v4, %v370_v9 }
 0x15a   :  { %v4165_v23 = vcombine.low %v374_v11, %v378_v12  ;;  %v422_v62 = vld [vmem:[#allocation4 + $0x6d0] sm:$0xff] }
 0x15b   :  { %v426_v0 = vld [vmem:[#allocation4 + $0x6f0] sm:$0xff] }
 0x15c   :  { %1929 = vmatpush1.bf16.msra.mxu0 %v4093_v13  ;;  %2011 = vmatpush1.bf16.msra.mxu1 %v4095_v17  ;;  %v375_v13 = vld [vmem:[#allocation4 + $0x558] sm:$0xff]  ;;  %v4159_v17 = vcombine.low %v367_v5, %v371_v6  ;;  %v4214_v4 = vcombine.high %v422_v62, %v426_v0 }
 0x15d   :  { %1930 = vmatprep.subr.bf16.mxu0 %v4102_v18  ;;  %2012 = vmatprep.subr.bf16.mxu1 %v4104_v20  ;;  %v4166_v18 = vcombine.high %v374_v11, %v378_v12  ;;  %v4168_v19 = vcombine.high %v375_v13, %v379_v14  ;;  %v386_v20 = vld [vmem:[#allocation4 + $0x5b0] sm:$0xff] }
 0x15e   :  { %v4173_v31 = vcombine.low %v382_v59, %v386_v20 }
 0x160   :  { %1931 = vmatpush1.bf16.msra.mxu0 %v4101_v21  ;;  %2013 = vmatpush1.bf16.msra.mxu1 %v4103_v24  ;;  %v383_v21 = vld [vmem:[#allocation4 + $0x598] sm:$0xff]  ;;  %v4167_v24 = vcombine.low %v375_v13, %v379_v14  ;;  %v438_v13 = vld [vmem:[#allocation4 + $0x750] sm:$0xff] }
 0x161   :  { %1932 = vmatprep.subr.bf16.mxu0 %v4110_v53  ;;  %2014 = vmatprep.subr.bf16.mxu1 %v4112_v28  ;;  %v4174_v53 = vcombine.high %v382_v59, %v386_v20  ;;  %v4176_v26 = vcombine.high %v383_v21, %v387_v22  ;;  %v394_v28 = vld [vmem:[#allocation4 + $0x5f0] sm:$0xff] }
 0x162   :  { %v4181_v40 = vcombine.low %v390_v27, %v394_v28  ;;  %v442_v14 = vld [vmem:[#allocation4 + $0x770] sm:$0xff] }
 0x163   :  { %v4230_v59 = vcombine.high %v438_v13, %v442_v14 }
 0x164   :  { %1933 = vmatpush1.bf16.msra.mxu0 %v4109_v29  ;;  %2015 = vmatpush1.bf16.msra.mxu1 %v4111_v32  ;;  %v391_v29 = vld [vmem:[#allocation4 + $0x5d8] sm:$0xff]  ;;  %v4175_v32 = vcombine.low %v383_v21, %v387_v22  ;;  %v446_v21 = vld [vmem:[#allocation4 + $0x790] sm:$0xff] }
 0x165   :  { %1934 = vmatprep.subr.bf16.mxu0 %v4118_v33  ;;  %2016 = vmatprep.subr.bf16.mxu1 %v4120_v36  ;;  %v4182_v33 = vcombine.high %v390_v27, %v394_v28  ;;  %v4184_v34 = vcombine.high %v391_v29, %v395_v30  ;;  %v402_v36 = vld [vmem:[#allocation4 + $0x630] sm:$0xff] }
 0x166   :  { %v4189_v48 = vcombine.low %v398_v63, %v402_v36  ;;  %v450_v22 = vld [vmem:[#allocation4 + $0x7b0] sm:$0xff] }
 0x167   :  { %v4238_v27 = vcombine.high %v446_v21, %v450_v22 }
 0x168   :  { %1935 = vmatpush1.bf16.msra.mxu0 %v4117_v38  ;;  %2017 = vmatpush1.bf16.msra.mxu1 %v4119_v41  ;;  %v399_v38 = vld [vmem:[#allocation4 + $0x618] sm:$0xff]  ;;  %v4183_v41 = vcombine.low %v391_v29, %v395_v30  ;;  %v454_v29 = vld [vmem:[#allocation4 + $0x7d0] sm:$0xff] }
 0x169   :  { %1945 = vmatprep.subr.bf16.mxu0 %v4126_v42  ;;  %2027 = vmatprep.subr.bf16.mxu1 %v4128_v46  ;;  %v4190_v42 = vcombine.high %v398_v63, %v402_v36  ;;  %v4192_v43 = vcombine.high %v399_v38, %v403_v39  ;;  %v410_v46 = vld [vmem:[#allocation4 + $0x670] sm:$0xff] }
 0x16a   :  { %v458_v30 = vld [vmem:[#allocation4 + $0x7f0] sm:$0xff] }
 0x16b   :  { %1937 = vmatmul.mubr.bf16.vlgmr.msra.gmra.mrb[4].mxu0 %v5384_v25  ;;  %2019 = vmatmul.mubr.bf16.vlgmr.msra.gmra.mrb[4].mxu1 %v5384_v25  ;;  %v4143_v25 = vcombine.low %v351_v51, %v355_v52  ;;  %v414_v52 = vld [vmem:[#allocation4 + $0x690] sm:$0xff]  ;;  %v4246_v63 = vcombine.high %v454_v29, %v458_v30 }
 0x16c   :  { %1946 = vmatpush1.bf16.msra.mxu0 %v4125_v47  ;;  %2028 = vmatpush1.bf16.msra.mxu1 %v4127_v49  ;;  %v407_v47 = vld [vmem:[#allocation4 + $0x658] sm:$0xff]  ;;  %v4191_v49 = vcombine.low %v399_v38, %v403_v39  ;;  %v4245_v38 = vcombine.low %v454_v29, %v458_v30  ;;  %v4747_v29 = vld [vmem:[#allocation8 + $0xc8] sm:$0xff]  }
 0x16d   :  { %1947 = vmatprep.subr.bf16.mxu0 %v4134_v50  ;;  %2029 = vmatprep.subr.bf16.mxu1 %v4136_v54  ;;  %v4198_v50 = vcombine.high %v406_v45, %v410_v46  ;;  %v4200_v51 = vcombine.high %v407_v47, %v411_v16  ;;  %v418_v54 = vld [vmem:[#allocation4 + $0x6b0] sm:$0xff]  ;;  %v4730_v30 = vld [vmem:[#allocation8 + $0x8] sm:$0xff]  }
 0x16e   :  { %1977 = vmatprep.mubr.bf16.mxu0 %v5386_v35  ;;  %2059 = vmatprep.mubr.bf16.mxu1 %v5386_v35  ;;  %v4160_v35 = vcombine.high %v367_v5, %v371_v6  ;;  %v4206_v60 = vcombine.high %v414_v52, %v418_v54  ;;  %v430_v5 = vld [vmem:[#allocation4 + $0x710] sm:$0xff] }
 0x16f   :  { %v434_v6 = vld [vmem:[#allocation4 + $0x730] sm:$0xff] }
 0x170   :  { %1948 = vmatpush1.bf16.msra.mxu0 %v4133_v55  ;;  %2030 = vmatpush1.bf16.msra.mxu1 %v4135_v56  ;;  %v415_v55 = vld [vmem:[#allocation4 + $0x698] sm:$0xff]  ;;  %v4222_v11 = vcombine.high %v430_v5, %v434_v6 }
 0x171   :  { %1949 = vmatprep.subr.bf16.mxu0 %v4142_v57  ;;  %2031 = vmatprep.subr.bf16.mxu1 %v4144_v58  ;;  %v419_v56 = vld [vmem:[#allocation4 + $0x6b8] sm:$0xff]  ;;  %v4197_v57 = vcombine.low %v406_v45, %v410_v46  ;;  %v4199_v58 = vcombine.low %v407_v47, %v411_v16  ;;  %v4699_v45 = vld [vmem:[#allocation6 + $0x48] sm:$0xff]  }
 0x172   :  { %v4208_v61 = vcombine.high %v415_v55, %v419_v56  ;;  %v4701_v46 = vld [vmem:[#allocation6 + $0xc8] sm:$0xff]  }
 0x173   :  { %v4700_v47 = vld [vmem:[#allocation6 + $0x8] sm:$0xff]  }
 0x174   :  { %1950 = vmatpush1.bf16.msra.mxu0 %v4141_v1  ;;  %2032 = vmatpush1.bf16.msra.mxu1 %v4143_v25  ;;  %v423_v1 = vld [vmem:[#allocation4 + $0x6d8] sm:$0xff]  ;;  %v4702_v16 = vld [vmem:[#allocation6 + $0x88] sm:$0xff]  }
 0x175   :  { %1951 = vmatprep.subr.bf16.mxu0 %v4150_v2  ;;  %2033 = vmatprep.subr.bf16.mxu1 %v4152_v3  ;;  %v427_v25 = vld [vmem:[#allocation4 + $0x6f8] sm:$0xff]  ;;  %v4205_v2 = vcombine.low %v414_v52, %v418_v54  ;;  %v4207_v3 = vcombine.low %v415_v55, %v419_v56  ;;  %v4711_v56 = vld [vmem:[#allocation6 + $0x60] sm:$0xff]  }
 0x176   :  { %v4216_v9 = vcombine.high %v423_v1, %v427_v25  ;;  %v4707_v52 = vld [vmem:[#allocation6 + $0x58] sm:$0xff]  }
 0x177   :  { %v4709_v54 = vld [vmem:[#allocation6 + $0xd8] sm:$0xff]  }
 0x178   :  { %1952 = vmatpush1.bf16.msra.mxu0 %v4149_v7  ;;  %2034 = vmatpush1.bf16.msra.mxu1 %v4151_v8  ;;  %v431_v7 = vld [vmem:[#allocation4 + $0x718] sm:$0xff] }
 0x179   :  { %1953 = vmatprep.subr.bf16.mxu0 %v4158_v10  ;;  %2035 = vmatprep.subr.bf16.mxu1 %v4160_v35  ;;  %v435_v8 = vld [vmem:[#allocation4 + $0x738] sm:$0xff]  ;;  %v4213_v10 = vcombine.low %v422_v62, %v426_v0  ;;  %v4215_v35 = vcombine.low %v423_v1, %v427_v25  ;;  %v4717_v62 = vld [vmem:[#allocation6 + $0xe8] sm:$0xff]   ;;  %v4719_v25 = vld [vmem:[#allocation6 + $0x70] sm:$0xff]  }
 0x17a   :  { %v4224_v12 = vcombine.high %v431_v7, %v435_v8  ;;  %v4708_v55 = vld [vmem:[#allocation6 + $0x18] sm:$0xff]   ;;  %v4716_v0 = vld [vmem:[#allocation6 + $0x28] sm:$0xff]  }
 0x17b   :  { %v4718_v1 = vld [vmem:[#allocation6 + $0xa8] sm:$0xff]  }
 0x17c   :  { %1954 = vmatpush1.bf16.msra.mxu0 %v4157_v15  ;;  %2036 = vmatpush1.bf16.msra.mxu1 %v4159_v17  ;;  %v439_v15 = vld [vmem:[#allocation4 + $0x758] sm:$0xff] }
 0x17d   :  { %1955 = vmatprep.subr.bf16.mxu0 %v4166_v18  ;;  %2037 = vmatprep.subr.bf16.mxu1 %v4168_v19  ;;  %v443_v17 = vld [vmem:[#allocation4 + $0x778] sm:$0xff]  ;;  %v4221_v18 = vcombine.low %v430_v5, %v434_v6  ;;  %v4223_v19 = vcombine.low %v431_v7, %v435_v8  ;;  %v4727_v8 = vld [vmem:[#allocation8 + $0x40] sm:$0xff]  }
 0x17e   :  { %v4232_v20 = vcombine.high %v439_v15, %v443_v17  ;;  %v4725_v5 = vld [vmem:[#allocation6 + $0xf8] sm:$0xff]  }
 0x17f   :  { %v4724_v6 = vld [vmem:[#allocation6 + $0x38] sm:$0xff]  }
 0x180   :  { %1956 = vmatpush1.bf16.msra.mxu0 %v4165_v23  ;;  %2038 = vmatpush1.bf16.msra.mxu1 %v4167_v24  ;;  %v447_v23 = vld [vmem:[#allocation4 + $0x798] sm:$0xff] }
 0x181   :  { %1957 = vmatprep.subr.bf16.mxu0 %v4174_v53  ;;  %2039 = vmatprep.subr.bf16.mxu1 %v4176_v26  ;;  %v451_v24 = vld [vmem:[#allocation4 + $0x7b8] sm:$0xff]  ;;  %v4229_v53 = vcombine.low %v438_v13, %v442_v14  ;;  %v4231_v26 = vcombine.low %v439_v15, %v443_v17 }
 0x182   :  { %v4240_v28 = vcombine.high %v447_v23, %v451_v24  ;;  %v4726_v7 = vld [vmem:[#allocation6 + $0xb8] sm:$0xff]  }
 0x184   :  { %1958 = vmatpush1.bf16.msra.mxu0 %v4173_v31  ;;  %2040 = vmatpush1.bf16.msra.mxu1 %v4175_v32  ;;  %v455_v31 = vld [vmem:[#allocation4 + $0x7d8] sm:$0xff] }
 0x185   :  { %1959 = vmatprep.subr.bf16.mxu0 %v4182_v33  ;;  %2041 = vmatprep.subr.bf16.mxu1 %v4184_v34  ;;  %v459_v32 = vld [vmem:[#allocation4 + $0x7f8] sm:$0xff]  ;;  %v4237_v33 = vcombine.low %v446_v21, %v450_v22  ;;  %v4239_v34 = vcombine.low %v447_v23, %v451_v24  ;;  %v4728_v23 = vld [vmem:[#allocation8] sm:$0xff]  }
 0x186   :  { %v4248_v36 = vcombine.high %v455_v31, %v459_v32  ;;  %v4247_v39 = vcombine.low %v455_v31, %v459_v32  ;;  %v4731_v31 = vld [vmem:[#allocation8 + $0x50] sm:$0xff]   ;;  %v4749_v32 = vld [vmem:[#allocation8 + $0x88] sm:$0xff]  }
 0x188   :  { %1960 = vmatpush1.bf16.msra.mxu0 %v4181_v40  ;;  %2042 = vmatpush1.bf16.msra.mxu1 %v4183_v41  ;;  %v4695_v40 = vld [vmem:[#allocation6 + $0x40] sm:$0xff]  }
 0x189   :  { %1961 = vmatprep.subr.bf16.mxu0 %v4190_v42  ;;  %2043 = vmatprep.subr.bf16.mxu1 %v4192_v43  ;;  %v4697_v41 = vld [vmem:[#allocation6 + $0xc0] sm:$0xff]  }
 0x18a   :  { %v4696_v42 = vld [vmem:[#allocation6] sm:$0xff]  }
 0x18b   :  { %v4698_v43 = vld [vmem:[#allocation6 + $0x80] sm:$0xff]  }
 0x18c   :  { %1962 = vmatpush1.bf16.msra.mxu0 %v4189_v48  ;;  %2044 = vmatpush1.bf16.msra.mxu1 %v4191_v49  ;;  %v4703_v48 = vld [vmem:[#allocation6 + $0x50] sm:$0xff]  }
 0x18d   :  { %1963 = vmatprep.subr.bf16.mxu0 %v4198_v50  ;;  %2045 = vmatprep.subr.bf16.mxu1 %v4200_v51  ;;  %v4705_v49 = vld [vmem:[#allocation6 + $0xd0] sm:$0xff]  }
 0x18e   :  { %v4704_v50 = vld [vmem:[#allocation6 + $0x10] sm:$0xff]  }
 0x18f   :  { %v4706_v51 = vld [vmem:[#allocation6 + $0x90] sm:$0xff]  }
 0x190   :  { %1964 = vmatpush1.bf16.msra.mxu0 %v4197_v57  ;;  %2046 = vmatpush1.bf16.msra.mxu1 %v4199_v58  ;;  %v4713_v57 = vld [vmem:[#allocation6 + $0xe0] sm:$0xff]  }
 0x191   :  { %1965 = vmatprep.subr.bf16.mxu0 %v4206_v60  ;;  %2047 = vmatprep.subr.bf16.mxu1 %v4208_v61  ;;  %v4712_v58 = vld [vmem:[#allocation6 + $0x20] sm:$0xff]   ;;  %v4715_v61 = vld [vmem:[#allocation6 + $0x68] sm:$0xff]  }
 0x192   :  { %v4714_v60 = vld [vmem:[#allocation6 + $0xa0] sm:$0xff]  }
 0x194   :  { %1966 = vmatpush1.bf16.msra.mxu0 %v4205_v2  ;;  %2048 = vmatpush1.bf16.msra.mxu1 %v4207_v3  ;;  %v4721_v2 = vld [vmem:[#allocation6 + $0xf0] sm:$0xff]  }
 0x195   :  { %1967 = vmatprep.subr.bf16.mxu0 %v4214_v4  ;;  %2049 = vmatprep.subr.bf16.mxu1 %v4216_v9  ;;  %v4720_v3 = vld [vmem:[#allocation6 + $0x30] sm:$0xff]   ;;  %v4723_v9 = vld [vmem:[#allocation6 + $0x78] sm:$0xff]  }
 0x196   :  { %v4722_v4 = vld [vmem:[#allocation6 + $0xb0] sm:$0xff]  }
 0x198   :  { %1968 = vmatpush1.bf16.msra.mxu0 %v4213_v10  ;;  %2050 = vmatpush1.bf16.msra.mxu1 %v4215_v35  ;;  %v4743_v10 = vld [vmem:[#allocation8 + $0xc0] sm:$0xff]  }
 0x199   :  { %1969 = vmatprep.subr.bf16.mxu0 %v4222_v11  ;;  %2051 = vmatprep.subr.bf16.mxu1 %v4224_v12 }
 0x19c   :  { %1970 = vmatpush1.bf16.msra.mxu0 %v4221_v18  ;;  %2052 = vmatpush1.bf16.msra.mxu1 %v4223_v19 }
 0x19d   :  { %1971 = vmatprep.subr.bf16.mxu0 %v4230_v59  ;;  %2053 = vmatprep.subr.bf16.mxu1 %v4232_v20 }
 0x1a0   :  { %1972 = vmatpush1.bf16.msra.mxu0 %v4229_v53  ;;  %2054 = vmatpush1.bf16.msra.mxu1 %v4231_v26  ;;  %v4729_v26 = vld [vmem:[#allocation8 + $0x48] sm:$0xff]  }
 0x1a1   :  { %1973 = vmatprep.subr.bf16.mxu0 %v4238_v27  ;;  %2055 = vmatprep.subr.bf16.mxu1 %v4240_v28  ;;  %v4745_v28 = vld [vmem:[#allocation8 + $0x80] sm:$0xff]  }
 0x1a4   :  { %1974 = vmatpush1.bf16.msra.mxu0 %v4237_v33  ;;  %2056 = vmatpush1.bf16.msra.mxu1 %v4239_v34  ;;  %v4751_v33 = vld [vmem:[#allocation8 + $0xd0] sm:$0xff]  }
 0x1a5   :  { %1975 = vmatprep.subr.bf16.mxu0 %v4246_v63  ;;  %2057 = vmatprep.subr.bf16.mxu1 %v4248_v36  ;;  %v4732_v34 = vld [vmem:[#allocation8 + $0x10] sm:$0xff]   ;;  %v4733_v63 = vld [vmem:[#allocation8 + $0x58] sm:$0xff]  }
 0x1a6   :  { %v4753_v36 = vld [vmem:[#allocation8 + $0x90] sm:$0xff]  }
 0x1a8   :  { %1976 = vmatpush1.bf16.msra.mxu0 %v4245_v38  ;;  %2058 = vmatpush1.bf16.msra.mxu1 %v4247_v39  ;;  %v4755_v38 = vld [vmem:[#allocation8 + $0xd8] sm:$0xff]  }
 0x1a9   :  { %4442 = vmatprep.subr.bf16.mxu0 %v4695_v40  ;;  %4464 = vmatprep.subr.bf16.mxu1 %v4697_v41  ;;  %v4734_v39 = vld [vmem:[#allocation8 + $0x18] sm:$0xff]   ;;  %v4735_v40 = vld [vmem:[#allocation8 + $0x60] sm:$0xff]  }
 0x1aa   :  { %v4757_v41 = vld [vmem:[#allocation8 + $0x98] sm:$0xff]  }
 0x1ab   :  { %1978 = vmatmul.mubr.bf16.vlgmr.msra.gmra.mrb[4].mxu0 %v5394_v37  ;;  %2060 = vmatmul.mubr.bf16.vlgmr.msra.gmra.mrb[4].mxu1 %v5394_v37  ;;  %v4710_v37 = vld [vmem:[#allocation6 + $0x98] sm:$0xff]  }
 0x1ac   :  { %4443 = vmatpush3.bf16.msra.mxu0 %v4696_v42  ;;  %4465 = vmatpush3.bf16.msra.mxu1 %v4698_v43  ;;  %v4759_v42 = vld [vmem:[#allocation8 + $0xe0] sm:$0xff]  }
 0x1ad   :  { %4444 = vmatprep.subr.bf16.mxu0 %v4699_v45  ;;  %4466 = vmatprep.subr.bf16.mxu1 %v4701_v46  ;;  %v4736_v43 = vld [vmem:[#allocation8 + $0x20] sm:$0xff]   ;;  %v4737_v45 = vld [vmem:[#allocation8 + $0x68] sm:$0xff]  }
 0x1ae   :  { %v4761_v46 = vld [vmem:[#allocation8 + $0xa0] sm:$0xff]  }
 0x1b0   :  { %4445 = vmatpush3.bf16.msra.mxu0 %v4700_v47  ;;  %4467 = vmatpush3.bf16.msra.mxu1 %v4702_v16  ;;  %v4763_v47 = vld [vmem:[#allocation8 + $0xe8] sm:$0xff]  }
 0x1b1   :  { %4446 = vmatprep.subr.bf16.mxu0 %v4703_v48  ;;  %4468 = vmatprep.subr.bf16.mxu1 %v4705_v49  ;;  %v4738_v16 = vld [vmem:[#allocation8 + $0x28] sm:$0xff]   ;;  %v4739_v48 = vld [vmem:[#allocation8 + $0x70] sm:$0xff]  }
 0x1b2   :  { %v4765_v49 = vld [vmem:[#allocation8 + $0xa8] sm:$0xff]  }
 0x1b4   :  { %4447 = vmatpush3.bf16.msra.mxu0 %v4704_v50  ;;  %4469 = vmatpush3.bf16.msra.mxu1 %v4706_v51  ;;  %v4767_v50 = vld [vmem:[#allocation8 + $0xf0] sm:$0xff]  }
 0x1b5   :  { %4448 = vmatprep.subr.bf16.mxu0 %v4707_v52  ;;  %4470 = vmatprep.subr.bf16.mxu1 %v4709_v54  ;;  %v4740_v51 = vld [vmem:[#allocation8 + $0x30] sm:$0xff]   ;;  %v4741_v52 = vld [vmem:[#allocation8 + $0x78] sm:$0xff]  }
 0x1b6   :  { %v4769_v54 = vld [vmem:[#allocation8 + $0xb0] sm:$0xff]  }
 0x1b8   :  { %4449 = vmatpush3.bf16.msra.mxu0 %v4708_v55  ;;  %4471 = vmatpush3.bf16.msra.mxu1 %v4710_v37  ;;  %v4771_v55 = vld [vmem:[#allocation8 + $0xf8] sm:$0xff]  }
 0x1b9   :  { %4450 = vmatprep.subr.bf16.mxu0 %v4711_v56  ;;  %4472 = vmatprep.subr.bf16.mxu1 %v4713_v57  ;;  %v4742_v37 = vld [vmem:[#allocation8 + $0x38] sm:$0xff]   ;;  %v4744_v56 = vld [vmem:[#allocation8 + $0x140] sm:$0xff]  }
 0x1ba   :  { %v4773_v57 = vld [vmem:[#allocation8 + $0xb8] sm:$0xff]  }
 0x1bc   :  { %4451 = vmatpush3.bf16.msra.mxu0 %v4712_v58  ;;  %4473 = vmatpush3.bf16.msra.mxu1 %v4714_v60  ;;  %v4746_v58 = vld [vmem:[#allocation8 + $0x100] sm:$0xff]   ;;  %v4748_v60 = vld [vmem:[#allocation8 + $0x148] sm:$0xff]  }
 0x1bd   :  { %4452 = vmatprep.subr.bf16.mxu0 %v4715_v61  ;;  %4474 = vmatprep.subr.bf16.mxu1 %v4717_v62  ;;  %v4750_v61 = vld [vmem:[#allocation8 + $0x108] sm:$0xff]   ;;  %v4752_v62 = vld [vmem:[#allocation8 + $0x150] sm:$0xff]  }
 0x1c0   :  { %4453 = vmatpush3.bf16.msra.mxu0 %v4716_v0  ;;  %4475 = vmatpush3.bf16.msra.mxu1 %v4718_v1  ;;  %v4754_v0 = vld [vmem:[#allocation8 + $0x110] sm:$0xff]   ;;  %v4756_v1 = vld [vmem:[#allocation8 + $0x158] sm:$0xff]  }
 0x1c1   :  { %4454 = vmatprep.subr.bf16.mxu0 %v4719_v25  ;;  %4476 = vmatprep.subr.bf16.mxu1 %v4721_v2  ;;  %v4758_v25 = vld [vmem:[#allocation8 + $0x118] sm:$0xff]   ;;  %v4760_v2 = vld [vmem:[#allocation8 + $0x160] sm:$0xff]  }
 0x1c4   :  { %4455 = vmatpush3.bf16.msra.mxu0 %v4720_v3  ;;  %4477 = vmatpush3.bf16.msra.mxu1 %v4722_v4  ;;  %v4762_v3 = vld [vmem:[#allocation8 + $0x120] sm:$0xff]   ;;  %v4764_v4 = vld [vmem:[#allocation8 + $0x168] sm:$0xff]  }
 0x1c5   :  { %4456 = vmatprep.subr.bf16.mxu0 %v4723_v9  ;;  %4478 = vmatprep.subr.bf16.mxu1 %v4725_v5  ;;  %v4766_v9 = vld [vmem:[#allocation8 + $0x128] sm:$0xff]   ;;  %v4768_v5 = vld [vmem:[#allocation8 + $0x170] sm:$0xff]  }
 0x1c8   :  { %4457 = vmatpush3.bf16.msra.mxu0 %v4724_v6  ;;  %4479 = vmatpush3.bf16.msra.mxu1 %v4726_v7  ;;  %v4770_v6 = vld [vmem:[#allocation8 + $0x130] sm:$0xff]   ;;  %v4772_v7 = vld [vmem:[#allocation8 + $0x178] sm:$0xff]  }
 0x1c9   :  { %4486 = vmatprep.subr.bf16.mxu0 %v4727_v8  ;;  %4508 = vmatprep.subr.bf16.mxu1 %v4743_v10  ;;  %v4774_v8 = vld [vmem:[#allocation8 + $0x138] sm:$0xff]   ;;  %v4775_v10 = vld [vmem:[#allocation9 + $0x40] sm:$0xff]  }
 0x1fe   :  { %v1815_v35 = vpop.f32.mrb[0].mxu0  ;;  %v1897_v12 = vpop.f32.mrb[0].mxu1 }
 0x1ff   :  { %v2068_v11 = vmax.f32 %v1815_v35, 0.0  ;;  %v1817_v13 = vpop.f32.mrb[1].mxu0  ;;  %v2070_v14 = vmax.f32 %v1897_v12, 0.0  ;;  %v1899_v17 = vpop.f32.mrb[1].mxu1 }
 0x200   :  { %v2069_v15 = vmax.f32 %v1817_v13, 0.0  ;;  %v1819_v18 = vpop.f32.mrb[2].mxu0  ;;  %v2071_v19 = vmax.f32 %v1899_v17, 0.0  ;;  %v1901_v59 = vpop.f32.mrb[2].mxu1 }
 0x201   :  { %v1820_v20 = vpop.f32.mrb[3].mxu0  ;;  %v1902_v22 = vpop.f32.mrb[3].mxu1  ;;  %v2077_v24 = vpack.c.bf16 %v2068_v11, %v2068_v11  ;;  %v5406_v27 = vpack.c.bf16 %v2070_v14, %v2070_v14 }
 0x202   :  { %v2078_v21 = vpack.c.bf16 %v2069_v15, %v2069_v15  ;;  %v2080_v53 = vpack.c.bf16 %v2071_v19, %v2071_v19 }
 0x204   :  { %2375 = vmatprep.mubr.bf16.mxu0 %v2078_v21  ;;  %2415 = vmatprep.mubr.bf16.mxu1 %v2080_v53 }
 0x205   :  { %2376 = vmatmul.mubr.bf16.vlgmr.msra.gmra.mrb[8].mxu0 %v2077_v24  ;;  %2416 = vmatmul.mubr.bf16.vlgmr.msra.gmra.mrb[8].mxu1 %v5406_v27 }
 0x206   :  { %4487 = vmatpush3.bf16.msra.mxu0 %v4728_v23  ;;  %2843 = vmatprep.mubr.bf16.mxu0 %v2080_v53  ;;  %v4776_v23 = vld [vmem:[#allocation9] sm:$0xff]  }
 0x207   :  { %4488 = vmatprep.subr.bf16.mxu0 %v4729_v26  ;;  %4509 = vmatpush3.bf16.msra.mxu1 %v4745_v28  ;;  %v4777_v26 = vld [vmem:[#allocation9 + $0x48] sm:$0xff]  }
 0x208   :  { %4510 = vmatprep.subr.bf16.mxu1 %v4747_v29  ;;  %v4778_v28 = vld [vmem:[#allocation9 + $0x8] sm:$0xff]   ;;  %v4779_v29 = vld [vmem:[#allocation9 + $0x50] sm:$0xff]  }
 0x20a   :  { %4489 = vmatpush3.bf16.msra.mxu0 %v4730_v30  ;;  %v4780_v30 = vld [vmem:[#allocation9 + $0x10] sm:$0xff]  }
 0x20b   :  { %4490 = vmatprep.subr.bf16.mxu0 %v4731_v31  ;;  %4511 = vmatpush3.bf16.msra.mxu1 %v4749_v32  ;;  %v4781_v31 = vld [vmem:[#allocation9 + $0x58] sm:$0xff]  }
 0x20c   :  { %4512 = vmatprep.subr.bf16.mxu1 %v4751_v33  ;;  %v4782_v32 = vld [vmem:[#allocation9 + $0x18] sm:$0xff]   ;;  %v4783_v33 = vld [vmem:[#allocation9 + $0x60] sm:$0xff]  }
 0x20e   :  { %4491 = vmatpush3.bf16.msra.mxu0 %v4732_v34  ;;  %v4784_v34 = vld [vmem:[#allocation9 + $0x20] sm:$0xff]  }
 0x20f   :  { %4492 = vmatprep.subr.bf16.mxu0 %v4733_v63  ;;  %4513 = vmatpush3.bf16.msra.mxu1 %v4753_v36  ;;  %v4785_v36 = vld [vmem:[#allocation9 + $0x68] sm:$0xff]  }
 0x210   :  { %4514 = vmatprep.subr.bf16.mxu1 %v4755_v38 }
 0x212   :  { %4493 = vmatpush3.bf16.msra.mxu0 %v4734_v39  ;;  %v4249_v39 = vld [vmem:[%s5481_s4] ss:$0 sm:$0xff] }
 0x213   :  { %4494 = vmatprep.subr.bf16.mxu0 %v4735_v40  ;;  %4515 = vmatpush3.bf16.msra.mxu1 %v4757_v41  ;;  %v4786_v41 = vld [vmem:[#allocation9 + $0x28] sm:$0xff]  }
 0x214   :  { %4516 = vmatprep.subr.bf16.mxu1 %v4759_v42 }
 0x216   :  { %4495 = vmatpush3.bf16.msra.mxu0 %v4736_v43 }
 0x217   :  { %4496 = vmatprep.subr.bf16.mxu0 %v4737_v45  ;;  %4517 = vmatpush3.bf16.msra.mxu1 %v4761_v46 }
 0x218   :  { %4518 = vmatprep.subr.bf16.mxu1 %v4763_v47 }
 0x21a   :  { %4497 = vmatpush3.bf16.msra.mxu0 %v4738_v16 }
 0x21b   :  { %4498 = vmatprep.subr.bf16.mxu0 %v4739_v48  ;;  %4519 = vmatpush3.bf16.msra.mxu1 %v4765_v49 }
 0x21c   :  { %4520 = vmatprep.subr.bf16.mxu1 %v4767_v50  ;;  %v4787_v50 = vld [vmem:[#allocation9 + $0x70] sm:$0xff]  }
 0x21e   :  { %4499 = vmatpush3.bf16.msra.mxu0 %v4740_v51  ;;  %v4788_v51 = vld [vmem:[#allocation9 + $0x30] sm:$0xff]  }
 0x21f   :  { %4500 = vmatprep.subr.bf16.mxu0 %v4741_v52  ;;  %4521 = vmatpush3.bf16.msra.mxu1 %v4769_v54  ;;  %v4789_v54 = vld [vmem:[#allocation9 + $0x78] sm:$0xff]  }
 0x220   :  { %4522 = vmatprep.subr.bf16.mxu1 %v4771_v55  ;;  %v4790_v55 = vld [vmem:[#allocation9 + $0x38] sm:$0xff]  }
 0x222   :  { %4501 = vmatpush3.bf16.msra.mxu0 %v4742_v37  ;;  %v4791_v37 = vld [vmem:[#allocation11] sm:$0xff]  }
 0x223   :  { %4530 = vmatprep.subr.bf16.mxu0 %v4744_v56  ;;  %4523 = vmatpush3.bf16.msra.mxu1 %v4773_v57  ;;  %v5132_v56 = vmov 0.0   ;;  %v4792_v57 = vld [vmem:[#allocation11 + $0x8] sm:$0xff]  }
 0x224   :  { %4552 = vmatprep.subr.bf16.mxu1 %v4775_v10 }
 0x225   :  { %2844 = vmatmul.mubr.bf16.vlgmr.msra.gmra.mrb[12].mxu0 %v5406_v27 }
 0x226   :  { %4531 = vmatpush3.bf16.msra.mxu0 %v4746_v58  ;;  %v4793_v58 = vld [vmem:[#allocation11 + $0x10] sm:$0xff]  }
 0x227   :  { %4532 = vmatprep.subr.bf16.mxu0 %v4748_v60  ;;  %v4794_v60 = vld [vmem:[#allocation11 + $0x18] sm:$0xff]  }
 0x22a   :  { %4533 = vmatpush3.bf16.msra.mxu0 %v4750_v61  ;;  %v4795_v61 = vld [vmem:[#allocation11 + $0x20] sm:$0xff]  }
 0x22b   :  { %4534 = vmatprep.subr.bf16.mxu0 %v4752_v62  ;;  %v4796_v62 = vld [vmem:[#allocation11 + $0x28] sm:$0xff]  }
 0x22e   :  { %4535 = vmatpush3.bf16.msra.mxu0 %v4754_v0 }
 0x22f   :  { %4536 = vmatprep.subr.bf16.mxu0 %v4756_v1 }
 0x232   :  { %4537 = vmatpush3.bf16.msra.mxu0 %v4758_v25 }
 0x233   :  { %4538 = vmatprep.subr.bf16.mxu0 %v4760_v2 }
 0x236   :  { %4539 = vmatpush3.bf16.msra.mxu0 %v4762_v3 }
 0x237   :  { %4540 = vmatprep.subr.bf16.mxu0 %v4764_v4 }
 0x23a   :  { %4541 = vmatpush3.bf16.msra.mxu0 %v4766_v9 }
 0x23b   :  { %4542 = vmatprep.subr.bf16.mxu0 %v4768_v5 }
 0x23e   :  { %4543 = vmatpush3.bf16.msra.mxu0 %v4770_v6 }
 0x23f   :  { %4544 = vmatprep.subr.bf16.mxu0 %v4772_v7 }
 0x242   :  { %4545 = vmatpush3.bf16.msra.mxu0 %v4774_v8 }
 0x243   :  { %4601 = vmatprep.subr.bf16.mxu0 %v5132_v56 }
 0x27e   :  { %v1979_v35 = vpop.f32.mrb[4].mxu0  ;;  %v2061_v12 = vpop.f32.mrb[4].mxu1 }
 0x27f   :  { %v2072_v11 = vmax.f32 %v1979_v35, 0.0  ;;  %v1981_v13 = vpop.f32.mrb[5].mxu0  ;;  %v2074_v14 = vmax.f32 %v2061_v12, 0.0  ;;  %v2063_v17 = vpop.f32.mrb[5].mxu1 }
 0x280   :  { %v2073_v15 = vmax.f32 %v1981_v13, 0.0  ;;  %v1983_v18 = vpop.f32.mrb[6].mxu0  ;;  %v2075_v19 = vmax.f32 %v2063_v17, 0.0  ;;  %v2065_v59 = vpop.f32.mrb[6].mxu1 }
 0x281   :  { %v1984_v20 = vpop.f32.mrb[7].mxu0  ;;  %v2066_v22 = vpop.f32.mrb[7].mxu1  ;;  %v2423_v24 = vpack.c.bf16 %v2072_v11, %v2072_v11  ;;  %v2425_v27 = vpack.c.bf16 %v2074_v14, %v2074_v14 }
 0x282   :  { %v2424_v21 = vpack.c.bf16 %v2073_v15, %v2073_v15  ;;  %v2426_v53 = vpack.c.bf16 %v2075_v19, %v2075_v19  ;;  %v4797_v20 = vld [vmem:[#allocation11 + $0x30] sm:$0xff]   ;;  %v4799_v22 = vld [vmem:[#allocation12] sm:$0xff]  }
 0x284   :  { %2883 = vmatprep.mubr.bf16.mxu1 %v2424_v21  ;;  %2923 = vmatprep.mubr.bf16.mxu0 %v2426_v53  ;;  %v4798_v21 = vld [vmem:[#allocation11 + $0x38] sm:$0xff]  }
 0x285   :  { %2884 = vmatmul.mubr.bf16.vlgmr.msra.gmra.mrb[12].mxu1 %v2423_v24  ;;  %2924 = vmatmul.mubr.bf16.vlgmr.msra.gmra.mrb[16].mxu0 %v2425_v27  ;;  %v4801_v24 = vld [vmem:[#allocation12 + $0x10] sm:$0xff]   ;;  %v4802_v53 = vld [vmem:[#allocation12 + $0x18] sm:$0xff]   ;;  %v4804_v27 = vld [vmem:[#allocation12 + $0x28] sm:$0xff]  }
 0x286   :  { %4553 = vmatpush3.bf16.msra.mxu1 %v4776_v23  ;;  %4602 = vmatpush3.bf16.msra.mxu0 %v4791_v37  ;;  %v4800_v23 = vld [vmem:[#allocation12 + $0x8] sm:$0xff]   ;;  %v4851_v37 = vld [vmem:[#allocation14 + $0xe4] ss:$16 sps:$4 sm:$0xff]  }
 0x287   :  { %4554 = vmatprep.subr.bf16.mxu1 %v4777_v26  ;;  %4603 = vmatprep.subr.bf16.mxu0 %v5132_v56  ;;  %v4803_v26 = vld [vmem:[#allocation12 + $0x20] sm:$0xff]  }
 0x288   :  { %4617 = vmatprep.mubr.msk.bf16.mxu0 %vm5133_vm0, %v5132_v56 }
 0x28a   :  { %4555 = vmatpush3.bf16.msra.mxu1 %v4778_v28  ;;  %4604 = vmatpush3.bf16.msra.mxu0 %v4792_v57  ;;  %v4849_v57 = vld [vmem:[#allocation14 + $0xe0] ss:$16 sps:$4 sm:$0xff]  }
 0x28b   :  { %4556 = vmatprep.subr.bf16.mxu1 %v4779_v29  ;;  %4605 = vmatprep.subr.bf16.mxu0 %v5132_v56  ;;  %v4330_v29 = vld [vmem:[%s5483_s6] ss:$0 sm:$0xff] }
 0x28e   :  { %4557 = vmatpush3.bf16.msra.mxu1 %v4780_v30  ;;  %4606 = vmatpush3.bf16.msra.mxu0 %v4793_v58  ;;  %v4857_v58 = vld [vmem:[#allocation14 + $0x104] ss:$16 sps:$4 sm:$0xff]  }
 0x28f   :  { %4558 = vmatprep.subr.bf16.mxu1 %v4781_v31  ;;  %4607 = vmatprep.subr.bf16.mxu0 %v5132_v56 }
 0x292   :  { %4559 = vmatpush3.bf16.msra.mxu1 %v4782_v32  ;;  %4608 = vmatpush3.bf16.msra.mxu0 %v4794_v60  ;;  %v4855_v60 = vld [vmem:[#allocation14 + $0x100] ss:$16 sps:$4 sm:$0xff]  }
 0x293   :  { %4560 = vmatprep.subr.bf16.mxu1 %v4783_v33  ;;  %4609 = vmatprep.subr.bf16.mxu0 %v5132_v56 }
 0x296   :  { %4561 = vmatpush3.bf16.msra.mxu1 %v4784_v34  ;;  %4610 = vmatpush3.bf16.msra.mxu0 %v4795_v61  ;;  %v4863_v61 = vld [vmem:[#allocation14 + $0x124] ss:$16 sps:$4 sm:$0xff]  }
 0x297   :  { %4562 = vmatprep.subr.bf16.mxu1 %v4785_v36  ;;  %4611 = vmatprep.subr.bf16.mxu0 %v5132_v56 }
 0x29a   :  { %4563 = vmatpush3.bf16.msra.mxu1 %v4786_v41  ;;  %4612 = vmatpush3.bf16.msra.mxu0 %v4796_v62  ;;  %v4809_v41 = vld [vmem:[#allocation14 + $0x4] ss:$16 sps:$4 sm:$0xff]   ;;  %v4861_v62 = vld [vmem:[#allocation14 + $0x120] ss:$16 sps:$4 sm:$0xff]  }
 0x29b   :  { %4564 = vmatprep.subr.bf16.mxu1 %v4787_v50  ;;  %4613 = vmatprep.subr.bf16.mxu0 %v5132_v56  ;;  %v4831_v50 = vld [vmem:[#allocation14 + $0x80] ss:$16 sps:$4 sm:$0xff]  }
 0x29e   :  { %4565 = vmatpush3.bf16.msra.mxu1 %v4788_v51  ;;  %4614 = vmatpush3.bf16.msra.mxu0 %v4797_v20  ;;  %v4839_v51 = vld [vmem:[#allocation14 + $0xa4] ss:$16 sps:$4 sm:$0xff]   ;;  %v4822_v20 = vld [vmem:[#allocation14 + $0x48] ss:$16 sps:$4 sm:$0xff]  }
 0x29f   :  { %4566 = vmatprep.subr.bf16.mxu1 %v4789_v54  ;;  %4615 = vmatprep.subr.bf16.mxu0 %v5132_v56  ;;  %v4845_v54 = vld [vmem:[#allocation14 + $0xc4] ss:$16 sps:$4 sm:$0xff]  }
 0x2a2   :  { %4567 = vmatpush3.bf16.msra.mxu1 %v4790_v55  ;;  %4616 = vmatpush3.bf16.msra.mxu0 %v4798_v21  ;;  %v4843_v55 = vld [vmem:[#allocation14 + $0xc0] ss:$16 sps:$4 sm:$0xff]   ;;  %v4830_v21 = vld [vmem:[#allocation14 + $0x6c] ss:$16 sps:$4 sm:$0xff]  }
 0x2a3   :  { %4621 = vmatprep.subr.bf16.mxu1 %v5132_v56  ;;  %3746 = vmatprep.subr.bf16.mxu0 %v4809_v41  ;;  %v4882_v41 = vld [vmem:[#allocation14 + $0x188] ss:$16 sps:$4 sm:$0xff]  }
 0x2d8   :  { %v4458_v63 = vpop.f32.mrb[8].mxu0  ;;  %v4480_v38 = vpop.f32.mrb[8].mxu1 }
 0x2d9   :  { %v4459_v40 = vpop.f32.mrb[9].mxu0  ;;  %v4481_v43 = vpop.f32.mrb[9].mxu1 }
 0x2da   :  { %v4460_v42 = vadd.f32 %v4459_v40, %v4458_v63  ;;  %v4461_v45 = vpop.f32.mrb[10].mxu0  ;;  %v4482_v46 = vadd.f32 %v4481_v43, %v4480_v38  ;;  %v4483_v47 = vpop.f32.mrb[10].mxu1  ;;  %v4805_v38 = vld [vmem:[#allocation12 + $0x30] sm:$0xff]  }
 0x2db   :  { %v4462_v16 = vpop.f32.mrb[11].mxu0  ;;  %v4484_v49 = vpop.f32.mrb[11].mxu1  ;;  %v4807_v40 = vld [vmem:[#allocation14] ss:$16 sps:$4 sm:$0xff]   ;;  %v4815_v43 = vld [vmem:[#allocation14 + $0x24] ss:$16 sps:$4 sm:$0xff]  }
 0x2dc   :  { %v2378_v48 = vadd.f32 %v4460_v42, %v4249_v39  ;;  %v4812_v42 = vld [vmem:[#allocation14 + $0xc] ss:$16 sps:$4 sm:$0xff]   ;;  %v4813_v45 = vld [vmem:[#allocation14 + $0x20] ss:$16 sps:$4 sm:$0xff]   ;;  %v4827_v16 = vld [vmem:[#allocation14 + $0x64] ss:$16 sps:$4 sm:$0xff]  }
 0x2dd   :  { %v4819_v47 = vld [vmem:[#allocation14 + $0x40] ss:$16 sps:$4 sm:$0xff]   ;;  %v4833_v49 = vld [vmem:[#allocation14 + $0x84] ss:$16 sps:$4 sm:$0xff]  }
 0x2de   :  { %v2418_v52 = vadd.f32 %v4482_v46, %v2378_v48  ;;  %v4821_v46 = vld [vmem:[#allocation14 + $0x44] ss:$16 sps:$4 sm:$0xff]   ;;  %v4825_v48 = vld [vmem:[#allocation14 + $0x60] ss:$16 sps:$4 sm:$0xff]  }
 0x2e0   :  { %v2931_v17 = vmax.f32 %v2418_v52, 0.0  ;;  %v4837_v52 = vld [vmem:[#allocation14 + $0xa0] ss:$16 sps:$4 sm:$0xff]  }
 0x2e2   :  { %v2933_v59 = vpack.c.bf16 %v2931_v17, %v2931_v17 }
 0x2f8   :  { %v4502_v0 = vpop.f32.mrb[12].mxu0 }
 0x2f9   :  { %v4503_v1 = vpop.f32.mrb[13].mxu0 }
 0x2fa   :  { %v4504_v25 = vadd.f32 %v4503_v1, %v4502_v0  ;;  %v4505_v2 = vpop.f32.mrb[14].mxu0  ;;  %v4869_v0 = vld [vmem:[#allocation14 + $0x144] ss:$16 sps:$4 sm:$0xff]   ;;  %v4867_v1 = vld [vmem:[#allocation14 + $0x140] ss:$16 sps:$4 sm:$0xff]  }
 0x2fb   :  { %v4506_v3 = vpop.f32.mrb[15].mxu0  ;;  %v4873_v2 = vld [vmem:[#allocation14 + $0x160] ss:$16 sps:$4 sm:$0xff]  }
 0x2fc   :  { %v2846_v6 = vadd.f32 %v4504_v25, %v4249_v39  ;;  %v4806_v39 = vld [vmem:[#allocation12 + $0x38] sm:$0xff]   ;;  %v4875_v25 = vld [vmem:[#allocation14 + $0x164] ss:$16 sps:$4 sm:$0xff]  }
 0x2fd   :  { %v4881_v3 = vld [vmem:[#allocation14 + $0x184] ss:$16 sps:$4 sm:$0xff]  }
 0x358   :  { %v4524_v4 = vpop.f32.mrb[12].mxu1  ;;  %v4546_v9 = vpop.f32.mrb[16].mxu0 }
 0x359   :  { %v4525_v5 = vpop.f32.mrb[13].mxu1  ;;  %v4547_v8 = vpop.f32.mrb[17].mxu0 }
 0x35a   :  { %v4526_v7 = vadd.f32 %v4525_v5, %v4524_v4  ;;  %v4527_v10 = vpop.f32.mrb[14].mxu1  ;;  %v4548_v35 = vadd.f32 %v4547_v8, %v4546_v9  ;;  %v4549_v11 = vpop.f32.mrb[18].mxu0  ;;  %v4879_v4 = vld [vmem:[#allocation14 + $0x180] ss:$16 sps:$4 sm:$0xff]   ;;  %v4887_v9 = vld [vmem:[#allocation14 + $0x1a4] ss:$16 sps:$4 sm:$0xff]  }
 0x35b   :  { %v4528_v12 = vpop.f32.mrb[15].mxu1  ;;  %v4550_v14 = vpop.f32.mrb[19].mxu0  ;;  %v4885_v5 = vld [vmem:[#allocation14 + $0x1a0] ss:$16 sps:$4 sm:$0xff]   ;;  %v4347_v8 = vld [vmem:[%s5485_s8] ss:$0 sm:$0xff] }
 0x35c   :  { %v2886_v13 = vadd.f32 %v4526_v7, %v2846_v6  ;;  %v4893_v6 = vld [vmem:[#allocation14 + $0x1c4] ss:$16 sps:$4 sm:$0xff]   ;;  %v4891_v7 = vld [vmem:[#allocation14 + $0x1c0] ss:$16 sps:$4 sm:$0xff]  }
 0x35e   :  { %v2926_v15 = vadd.f32 %v4548_v35, %v2886_v13 }
 0x360   :  { %v2932_v18 = vmax.f32 %v2926_v15, 0.0  ;;  %v4810_v15 = vld [vmem:[#allocation14 + $0x8] ss:$16 sps:$4 sm:$0xff]  }
 0x362   :  { %v2934_v19 = vpack.c.bf16 %v2932_v18, %v2932_v18  ;;  %v4818_v18 = vld [vmem:[#allocation14 + $0x2c] ss:$16 sps:$4 sm:$0xff]  }
 0x364   :  { %3102 = vmatprep.mubr.bf16.mxu1 %v2934_v19  ;;  %v4816_v19 = vld [vmem:[#allocation14 + $0x28] ss:$16 sps:$4 sm:$0xff]  }
 0x365   :  { %3103 = vmatmul.mubr.bf16.vlgmr.msra.gmra.mrb[16].mxu1 %v2933_v59  ;;  %v4824_v59 = vld [vmem:[#allocation14 + $0x4c] ss:$16 sps:$4 sm:$0xff]  }
 0x366   :  { %4637 = vmatprep.mubr.msk.bf16.mxu1 %vm5133_vm0, %v5132_v56  ;;  %4622 = vmatpush3.bf16.msra.mxu1 %v4799_v22  ;;  %v4828_v22 = vld [vmem:[#allocation14 + $0x68] ss:$16 sps:$4 sm:$0xff]  }
 0x367   :  { %4623 = vmatprep.subr.bf16.mxu1 %v5132_v56 }
 0x36a   :  { %4624 = vmatpush3.bf16.msra.mxu1 %v4800_v23  ;;  %v4836_v23 = vld [vmem:[#allocation14 + $0x8c] ss:$16 sps:$4 sm:$0xff]  }
 0x36b   :  { %4625 = vmatprep.subr.bf16.mxu1 %v5132_v56 }
 0x36e   :  { %4626 = vmatpush3.bf16.msra.mxu1 %v4801_v24  ;;  %v4834_v24 = vld [vmem:[#allocation14 + $0x88] ss:$16 sps:$4 sm:$0xff]  }
 0x36f   :  { %4627 = vmatprep.subr.bf16.mxu1 %v5132_v56 }
 0x372   :  { %4628 = vmatpush3.bf16.msra.mxu1 %v4802_v53  ;;  %v4842_v53 = vld [vmem:[#allocation14 + $0xac] ss:$16 sps:$4 sm:$0xff]  }
 0x373   :  { %4629 = vmatprep.subr.bf16.mxu1 %v5132_v56 }
 0x376   :  { %4630 = vmatpush3.bf16.msra.mxu1 %v4803_v26  ;;  %v4840_v26 = vld [vmem:[#allocation14 + $0xa8] ss:$16 sps:$4 sm:$0xff]  }
 0x377   :  { %4631 = vmatprep.subr.bf16.mxu1 %v5132_v56 }
 0x37a   :  { %4632 = vmatpush3.bf16.msra.mxu1 %v4804_v27  ;;  %v4848_v27 = vld [vmem:[#allocation14 + $0xcc] ss:$16 sps:$4 sm:$0xff]  }
 0x37b   :  { %4633 = vmatprep.subr.bf16.mxu1 %v5132_v56 }
 0x37e   :  { %4634 = vmatpush3.bf16.msra.mxu1 %v4805_v38  ;;  %v4878_v38 = vld [vmem:[#allocation14 + $0x16c] ss:$16 sps:$4 sm:$0xff]  }
 0x37f   :  { %4635 = vmatprep.subr.bf16.mxu1 %v5132_v56 }
 0x382   :  { %4636 = vmatpush3.bf16.msra.mxu1 %v4806_v39  ;;  %v4876_v39 = vld [vmem:[#allocation14 + $0x168] ss:$16 sps:$4 sm:$0xff]  }
 0x383   :  { %3787 = vmatprep.subr.bf16.mxu1 %v4812_v42  ;;  %v4890_v42 = vld [vmem:[#allocation14 + $0x1ac] ss:$16 sps:$4 sm:$0xff]  }
 0x438   :  { %v4568_v28 = vpop.f32.mrb[16].mxu1 }
 0x439   :  { %v4569_v30 = vpop.f32.mrb[17].mxu1 }
 0x43a   :  { %v4570_v31 = vadd.f32 %v4569_v30, %v4568_v28  ;;  %v4571_v32 = vpop.f32.mrb[18].mxu1  ;;  %v4846_v28 = vld [vmem:[#allocation14 + $0xc8] ss:$16 sps:$4 sm:$0xff]  }
 0x43b   :  { %v4572_v33 = vpop.f32.mrb[19].mxu1  ;;  %v4852_v30 = vld [vmem:[#allocation14 + $0xe8] ss:$16 sps:$4 sm:$0xff]  }
 0x43c   :  { %v3105_v34 = vadd.f32 %v4570_v31, %v4330_v29  ;;  %v4854_v29 = vld [vmem:[#allocation14 + $0xec] ss:$16 sps:$4 sm:$0xff]   ;;  %v4858_v32 = vld [vmem:[#allocation14 + $0x108] ss:$16 sps:$4 sm:$0xff]  }
 0x43d   :  { %v4860_v31 = vld [vmem:[#allocation14 + $0x10c] ss:$16 sps:$4 sm:$0xff]  }
 0x43e   :  { %v3110_v63 = vmax.f32 %v3105_v34, 0.0  ;;  %v4866_v33 = vld [vmem:[#allocation14 + $0x12c] ss:$16 sps:$4 sm:$0xff]   ;;  %v4864_v34 = vld [vmem:[#allocation14 + $0x128] ss:$16 sps:$4 sm:$0xff]  }
 0x440   :  { %v3111_v36 = vpack.c.bf16 %v3110_v63, %v3110_v63  ;;  %v4872_v63 = vld [vmem:[#allocation14 + $0x14c] ss:$16 sps:$4 sm:$0xff]  }
 0x442   :  { %4618 = vmatmul.mubr.bf16.vlgmr.msra.gmra.mrb[20].mxu0 %v3111_v36  ;;  %v4870_v36 = vld [vmem:[#allocation14 + $0x148] ss:$16 sps:$4 sm:$0xff]  }
 0x443   :  { %3747 = vmatpush1.bf16.msra.mxu0 %v4807_v40  ;;  %v4884_v40 = vld [vmem:[#allocation14 + $0x18c] ss:$16 sps:$4 sm:$0xff]  }
 0x444   :  { %3748 = vmatprep.subr.bf16.mxu0 %v4815_v43  ;;  %v4888_v43 = vld [vmem:[#allocation14 + $0x1a8] ss:$16 sps:$4 sm:$0xff]  }
 0x447   :  { %3749 = vmatpush1.bf16.msra.mxu0 %v4813_v45  ;;  %v4896_v45 = vld [vmem:[#allocation14 + $0x1cc] ss:$16 sps:$4 sm:$0xff]  }
 0x448   :  { %3750 = vmatprep.subr.bf16.mxu0 %v4821_v46  ;;  %v4894_v46 = vld [vmem:[#allocation14 + $0x1c8] ss:$16 sps:$4 sm:$0xff]  }
 0x44b   :  { %3751 = vmatpush1.bf16.msra.mxu0 %v4819_v47  ;;  %v173_v47 = vld [vmem:[%s5492_s15] sm:$0x3] }
 0x44c   :  { %3752 = vmatprep.subr.bf16.mxu0 %v4827_v16  ;;  %174 = vst [vmem:[#allocation2] sm:$0x3] %v173_v47  ;;  %v4899_v16 = vld [vmem:[#allocation14 + $0x1e4] ss:$16 sps:$4 sm:$0xff]  }
 0x44f   :  { %3753 = vmatpush1.bf16.msra.mxu0 %v4825_v48  ;;  %v4902_v48 = vld [vmem:[#allocation14 + $0x1ec] ss:$16 sps:$4 sm:$0xff]  }
 0x450   :  { %3754 = vmatprep.subr.bf16.mxu0 %v4833_v49  ;;  %v4897_v49 = vld [vmem:[#allocation14 + $0x1e0] ss:$16 sps:$4 sm:$0xff]  }
 0x453   :  { %3755 = vmatpush1.bf16.msra.mxu0 %v4831_v50  ;;  %v4900_v50 = vld [vmem:[#allocation14 + $0x1e8] ss:$16 sps:$4 sm:$0xff]  }
 0x454   :  { %3756 = vmatprep.subr.bf16.mxu0 %v4839_v51  ;;  %v3336_v51 = vld [vmem:[#allocation2] sm:$0x3] }
 0x457   :  { %3757 = vmatpush1.bf16.msra.mxu0 %v4837_v52  ;;  %v3339_v52 = vpack.c.bf16 %v3336_v51, %v3336_v51 }
 0x458   :  { %3758 = vmatprep.subr.bf16.mxu0 %v4845_v54  ;;  %v4356_v54 = vld [vmem:[%s5487_s10] ss:$0 sm:$0xff] }
 0x459   :  { %3778 = vmatprep.mubr.bf16.mxu0 %v3339_v52 }
 0x45b   :  { %3759 = vmatpush1.bf16.msra.mxu0 %v4843_v55 }
 0x45c   :  { %3760 = vmatprep.subr.bf16.mxu0 %v4851_v37 }
 0x45f   :  { %3761 = vmatpush1.bf16.msra.mxu0 %v4849_v57 }
 0x460   :  { %3762 = vmatprep.subr.bf16.mxu0 %v4857_v58 }
 0x463   :  { %3763 = vmatpush1.bf16.msra.mxu0 %v4855_v60 }
 0x464   :  { %3764 = vmatprep.subr.bf16.mxu0 %v4863_v61 }
 0x467   :  { %3765 = vmatpush1.bf16.msra.mxu0 %v4861_v62  ;;  %v4903_v62 = vld [vmem:[#allocation15] sm:$0xff]  }
 0x468   :  { %3766 = vmatprep.subr.bf16.mxu0 %v4869_v0  ;;  %v175_v0 = vld [vmem:[%s5493_s16] sm:$0x3] }
 0x469   :  { %176 = vst [vmem:[#allocation3] sm:$0x3] %v175_v0 }
 0x46b   :  { %3767 = vmatpush1.bf16.msra.mxu0 %v4867_v1  ;;  %v4904_v1 = vld [vmem:[#allocation15 + $0x8] sm:$0xff]  }
 0x46c   :  { %3768 = vmatprep.subr.bf16.mxu0 %v4875_v25  ;;  %v4905_v25 = vld [vmem:[#allocation15 + $0x10] sm:$0xff]  }
 0x46f   :  { %3769 = vmatpush1.bf16.msra.mxu0 %v4873_v2  ;;  %v4906_v2 = vld [vmem:[#allocation15 + $0x18] sm:$0xff]  }
 0x470   :  { %3770 = vmatprep.subr.bf16.mxu0 %v4881_v3  ;;  %v4907_v3 = vld [vmem:[#allocation15 + $0x20] sm:$0xff]  }
 0x473   :  { %3771 = vmatpush1.bf16.msra.mxu0 %v4879_v4  ;;  %v4908_v4 = vld [vmem:[#allocation15 + $0x28] sm:$0xff]  }
 0x474   :  { %3772 = vmatprep.subr.bf16.mxu0 %v4887_v9  ;;  %v4909_v9 = vld [vmem:[#allocation15 + $0x30] sm:$0xff]  }
 0x477   :  { %3773 = vmatpush1.bf16.msra.mxu0 %v4885_v5  ;;  %v4910_v5 = vld [vmem:[#allocation15 + $0x38] sm:$0xff]  }
 0x478   :  { %3774 = vmatprep.subr.bf16.mxu0 %v4893_v6  ;;  %v3408_v6 = vsub.s32 0, %v5355_v44 }
 0x47b   :  { %3775 = vmatpush1.bf16.msra.mxu0 %v4891_v7  ;;  %v3404_v7 = vld [vmem:[%s5489_s12] sm:$0xf] }
 0x47c   :  { %3776 = vmatprep.subr.bf16.mxu0 %v4899_v16  ;;  %v4432_v16 = vld [vmem:[%s5513_s3] ss:$0 sm:$0xff] }
 0x47f   :  { %3777 = vmatpush1.bf16.msra.mxu0 %v4897_v49 }
 0x480   :  { %4641 = vmatprep.subr.bf16.mxu0 %v5132_v56 }
 0x515   :  { %v3217_v10 = vpop.f32.mrb[20].mxu0 }
 0x516   :  { %v3218_v35 = vadd.f32 %v4347_v8, %v3217_v10  ;;  %v4619_v11 = vpop.f32.mrb[21].mxu0  ;;  %v3412_v8 = vsub.s32 1, %v5355_v44  ;;  %v3409_v10 = vrot.slane %v3404_v7, %v3408_v6 }
 0x517   :  { %v3220_v12 = vpop.f32.mrb[22].mxu0 }
 0x518   :  { %v3223_v13 = vmax.f32 %v3218_v35, 0.0  ;;  %v4620_v14 = vpop.f32.mrb[23].mxu0  ;;  %v3413_v35 = vrot.slane %v3404_v7, %v3412_v8 }
 0x51a   :  { %v3224_v17 = vpack.c.bf16 %v3223_v13, %v3223_v13  ;;  %v3420_v13 = vsub.s32 3, %v5355_v44 }
 0x51c   :  { %4638 = vmatmul.mubr.bf16.vlgmr.msra.gmra.mrb[20].mxu1 %v3224_v17 }
 0x51d   :  { %3788 = vmatpush1.bf16.msra.mxu1 %v4810_v15  ;;  %3819 = vmatprep.mubr.bf16.mxu1 %v3339_v52 }
 0x51e   :  { %3789 = vmatprep.subr.bf16.mxu1 %v4818_v18 }
 0x521   :  { %3790 = vmatpush1.bf16.msra.mxu1 %v4816_v19 }
 0x522   :  { %3791 = vmatprep.subr.bf16.mxu1 %v4824_v59 }
 0x525   :  { %3792 = vmatpush1.bf16.msra.mxu1 %v4822_v20 }
 0x526   :  { %3793 = vmatprep.subr.bf16.mxu1 %v4830_v21 }
 0x529   :  { %3794 = vmatpush1.bf16.msra.mxu1 %v4828_v22 }
 0x52a   :  { %3795 = vmatprep.subr.bf16.mxu1 %v4836_v23  ;;  %v3421_v23 = vrot.slane %v3404_v7, %v3420_v13 }
 0x52d   :  { %3796 = vmatpush1.bf16.msra.mxu1 %v4834_v24  ;;  %v3416_v24 = vsub.s32 2, %v5355_v44 }
 0x52e   :  { %3797 = vmatprep.subr.bf16.mxu1 %v4842_v53 }
 0x531   :  { %3798 = vmatpush1.bf16.msra.mxu1 %v4840_v26  ;;  %v3417_v26 = vrot.slane %v3404_v7, %v3416_v24 }
 0x532   :  { %3799 = vmatprep.subr.bf16.mxu1 %v4848_v27 }
 0x535   :  { %3800 = vmatpush1.bf16.msra.mxu1 %v4846_v28 }
 0x536   :  { %3801 = vmatprep.subr.bf16.mxu1 %v4854_v29 }
 0x539   :  { %3802 = vmatpush1.bf16.msra.mxu1 %v4852_v30 }
 0x53a   :  { %3803 = vmatprep.subr.bf16.mxu1 %v4860_v31 }
 0x53d   :  { %3804 = vmatpush1.bf16.msra.mxu1 %v4858_v32 }
 0x53e   :  { %3805 = vmatprep.subr.bf16.mxu1 %v4866_v33 }
 0x541   :  { %3806 = vmatpush1.bf16.msra.mxu1 %v4864_v34 }
 0x542   :  { %3807 = vmatprep.subr.bf16.mxu1 %v4872_v63  ;;  %v3337_v63 = vld [vmem:[#allocation3] sm:$0x3] }
 0x545   :  { %3808 = vmatpush1.bf16.msra.mxu1 %v4870_v36 }
 0x546   :  { %3809 = vmatprep.subr.bf16.mxu1 %v4878_v38 }
 0x549   :  { %3810 = vmatpush1.bf16.msra.mxu1 %v4876_v39 }
 0x54a   :  { %3811 = vmatprep.subr.bf16.mxu1 %v4884_v40 }
 0x54d   :  { %3812 = vmatpush1.bf16.msra.mxu1 %v4882_v41 }
 0x54e   :  { %3813 = vmatprep.subr.bf16.mxu1 %v4890_v42 }
 0x551   :  { %3814 = vmatpush1.bf16.msra.mxu1 %v4888_v43 }
 0x552   :  { %3815 = vmatprep.subr.bf16.mxu1 %v4896_v45 }
 0x555   :  { %3816 = vmatpush1.bf16.msra.mxu1 %v4894_v46 }
 0x556   :  { %3817 = vmatprep.subr.bf16.mxu1 %v4902_v48 }
 0x559   :  { %3818 = vmatpush1.bf16.msra.mxu1 %v4900_v50 }
 0x5ef   :  { %v3330_v55 = vpop.f32.mrb[20].mxu1 }
 0x5f0   :  { %v3331_v37 = vadd.f32 %v4356_v54, %v3330_v55  ;;  %v4639_v57 = vpop.f32.mrb[21].mxu1 }
 0x5f1   :  { %v3333_v58 = vpop.f32.mrb[22].mxu1 }
 0x5f2   :  { %v3338_v60 = vpack.c.bf16 %v3331_v37, %v3331_v37  ;;  %v4640_v61 = vpop.f32.mrb[23].mxu1 }
 0x5f4   :  { %3779 = vmatmul.mubr.bf16.vlgmr.msra.gmra.mrb[24].mxu0 %v3338_v60  ;;  %3820 = vmatmul.mubr.bf16.vlgmr.msra.gmra.mrb[24].mxu1 %v3338_v60 }
 0x5f5   :  { %4657 = vmatprep.mubr.msk.bf16.mxu0 %vm5133_vm0, %v5132_v56  ;;  %4642 = vmatpush3.bf16.msra.mxu0 %v4903_v62 }
 0x5f6   :  { %4643 = vmatprep.subr.bf16.mxu0 %v5132_v56 }
 0x5f9   :  { %4644 = vmatpush3.bf16.msra.mxu0 %v4904_v1 }
 0x5fa   :  { %4645 = vmatprep.subr.bf16.mxu0 %v5132_v56 }
 0x5fd   :  { %4646 = vmatpush3.bf16.msra.mxu0 %v4905_v25 }
 0x5fe   :  { %4647 = vmatprep.subr.bf16.mxu0 %v5132_v56 }
 0x601   :  { %4648 = vmatpush3.bf16.msra.mxu0 %v4906_v2 }
 0x602   :  { %4649 = vmatprep.subr.bf16.mxu0 %v5132_v56 }
 0x605   :  { %4650 = vmatpush3.bf16.msra.mxu0 %v4907_v3 }
 0x606   :  { %4651 = vmatprep.subr.bf16.mxu0 %v5132_v56 }
 0x609   :  { %4652 = vmatpush3.bf16.msra.mxu0 %v4908_v4 }
 0x60a   :  { %4653 = vmatprep.subr.bf16.mxu0 %v5132_v56 }
 0x60d   :  { %4654 = vmatpush3.bf16.msra.mxu0 %v4909_v9 }
 0x60e   :  { %4655 = vmatprep.subr.bf16.mxu0 %v5132_v56 }
 0x611   :  { %4656 = vmatpush3.bf16.msra.mxu0 %v4910_v5 }
 0x6c7   :  { %v3780_v11 = vpop.f32.mrb[24].mxu0  ;;  %v3821_v12 = vpop.f32.mrb[24].mxu1 }
 0x6c8   :  { %v3781_v14 = vadd.f32 %v3780_v11, %v3409_v10  ;;  %v3782_v15 = vpop.f32.mrb[25].mxu0  ;;  %v3823_v17 = vpop.f32.mrb[25].mxu1  ;;  %v3822_v28 = vadd.f32 %v3821_v12, %v3417_v26 }
 0x6c9   :  { %v3783_v18 = vadd.f32 %v3782_v15, %v3413_v35  ;;  %v3784_v56 = vpop.f32.mrb[26].mxu0  ;;  %v3825_v19 = vpop.f32.mrb[26].mxu1  ;;  %v3824_v53 = vadd.f32 %v3823_v17, %v3421_v23 }
 0x6ca   :  { %v4429_v59 = vmul.f32 -1.442695, %v3781_v14  ;;  %v3785_v20 = vpop.f32.mrb[27].mxu0  ;;  %v3826_v21 = vpop.f32.mrb[27].mxu1 }
 0x6cb   :  { %v4430_v22 = vmul.f32 -1.442695, %v3783_v18  ;;  %v4431_v27 = vmul.f32 -1.442695, %v3824_v53 }
 0x6cc   :  { %4911 = vpow2.f32 %v4429_v59 }
 0x6cd   :  { %4913 = vpow2.f32 %v4430_v22 }
 0x6ce   :  { %4915 = vpow2.f32 %v4431_v27 }
 0x6cf   :  { %4917 = vtanh.f32 %v3822_v28 }
 0x6d6   :  { %v4912_v29 = vpop.eup %4911 }
 0x6d7   :  { %v4914_v30 = vpop.eup %4913  ;;  %v3831_v31 = vadd.f32 1.0, %v4912_v29 }
 0x6d8   :  { %v3837_v32 = vadd.f32 1.0, %v4914_v30  ;;  %v4916_v33 = vpop.eup %4915 }
 0x6d9   :  { %4919 = vrcp.f32 %v3831_v31  ;;  %v4918_v34 = vpop.eup %4917  ;;  %v3844_v44 = vadd.f32 1.0, %v4916_v33 }
 0x6da   :  { %4921 = vrcp.f32 %v3837_v32 }
 0x6db   :  { %4923 = vrcp.f32 %v3844_v44 }
 0x6e3   :  { %v4920_v36 = vpop.eup %4919 }
 0x6e4   :  { %v4922_v38 = vpop.eup %4921  ;;  %v3848_v39 = vmul.f32 %v4920_v36, %v4918_v34 }
 0x6e5   :  { %v3847_v40 = vmul.f32 %v4922_v38, %v3337_v63  ;;  %v4924_v42 = vpop.eup %4923 }
 0x6e7   :  { %v3849_v41 = vadd.f32 %v3848_v39, %v3847_v40 }
 0x6e9   :  { %4925 = vtanh.f32 %v3849_v41  ;;  %3972 = vst [vmem:[#allocation3] sm:$0x3] %v3849_v41  ;;  %3975 = vst [vmem:[%s5496_s19] sm:$0x3] %v3849_v41 }
 0x6f3   :  { %v4926_v43 = vpop.eup %4925 }
 0x6f4   :  { %v3851_v45 = vmul.f32 %v4926_v43, %v4924_v42 }
 0x6f6   :  { %v3852_v46 = vmax.f32 %v3851_v45, 0.0  ;;  %3971 = vst [vmem:[#allocation2] sm:$0x3] %v3851_v45  ;;  %3974 = vst [vmem:[%s5495_s18] sm:$0x3] %v3851_v45  ;;  %s5514_s18 = sld [smem:[#allocation27_spill]] }
 0x6f8   :  { %v3853_v47 = vpack.c.bf16 %v3852_v46, %v3852_v46 }
 0x6fa   :  { %4658 = vmatmul.mubr.bf16.vlgmr.msra.gmra.mrb[28].mxu0 %v3853_v47 }
 0x7cd   :  { %v3959_v48 = vpop.f32.mrb[28].mxu0 }
 0x7ce   :  { %v3960_v49 = vadd.f32 %v4432_v16, %v3959_v48  ;;  %v4659_v50 = vpop.f32.mrb[29].mxu0 }
 0x7cf   :  { %v3962_v51 = vpop.f32.mrb[30].mxu0 }
 0x7d0   :  { %v4441_v52 = vmul.f32 -1.442695, %v3960_v49  ;;  %v4660_v54 = vpop.f32.mrb[31].mxu0 }
 0x7d2   :  { %4927 = vpow2.f32 %v4441_v52 }
 0x7dc   :  { %v4928_v55 = vpop.eup %4927 }
 0x7dd   :  { %v3968_v37 = vadd.f32 1.0, %v4928_v55 }
 0x7df   :  { %4929 = vrcp.f32 %v3968_v37 }
 0x7e9   :  { %v4930_v57 = vpop.eup %4929 }
 0x7ea   :  { %3973 = vst [vmem:[%s5514_s18] sm:$0x3] %v4930_v57 }
 0x7eb   :  { %3988 = vsyncpa [#allocation5], 1 }
 0x7ec   :  { %3989 = vsyncpa [#allocation7], 1 }
 0x7ed   :  { %3990 = vsyncpa [#allocation10], 1 }
 0x7ee   :  { %3991 = vsyncpa [#allocation13], 1 }
 0x7ef   :  { %3992 = vsyncpa [#allocation16], 1 }

</bundles_post_ra>
